<compile_context>
chip_gen: v7x
topology: tpu7x:2x2x1
jax: 0.10.0
libtpu: 0.0.40
codegen_flags: <defaults>
</compile_context>

<pallas_src>
import functools

import jax
import jax.numpy as jnp
import numpy as np
from jax import lax
from jax.experimental import pallas as pl
from jax.experimental.pallas import tpu as pltpu


# ----------------------------------------------------------------------------
# Fused Pallas kernel: all GRU layers + FC head in a single invocation
# ----------------------------------------------------------------------------
def _fused_gru_fc_kernel(num_layers, seq_len, batch_pad, *refs):
    """Whole forward pass in one invocation.

    refs layout:
      refs[0]                x_ref    (S*Bp, I)   time-major rows: t*Bp .. t*Bp+Bp-1 = step t
      refs[1 + 4*l + 0]      wih_l    (I_l, 3H)   bf16, fused gates r|z|n
      refs[1 + 4*l + 1]      whh_l    (H, 3H)     bf16, fused gates r|z|n
      refs[1 + 4*l + 2]      bgi_l    (1, 3H)     f32: [b_ir+b_hr | b_iz+b_hz | b_in]
      refs[1 + 4*l + 3]      bhn_l    (1, H)      f32: b_hn (stays inside the r* term)
      refs[1 + 4*L]          fcw_ref  (S, Bp, H)  fc weight, pre-broadcast over batch
      refs[2 + 4*L]          fcb_ref  (1, 1)
      refs[3 + 4*L]          o_ref    (Bp, 1)     output
    """
    x_ref = refs[0]
    fcw_ref = refs[1 + 4 * num_layers]
    fcb_ref = refs[2 + 4 * num_layers]
    o_ref = refs[3 + 4 * num_layers]

    cur = x_ref[...]                                   # (S*Bp, I) f32, current layer's input seq
    hs_last = None
    H = None

    for l in range(num_layers):
        wih = refs[1 + 4 * l][...]                     # (I_l, 3H) bf16
        whh = refs[2 + 4 * l][...]                     # (H, 3H)   bf16
        b_gi = refs[3 + 4 * l][...]                    # (1, 3H)   f32
        b_hn = refs[4 + 4 * l][...]                    # (1, H)    f32
        H = whh.shape[0]
        last = l == num_layers - 1

        # Hoisted input projection: ONE fused matmul over the whole sequence.
        gi = jnp.dot(cur.astype(jnp.bfloat16), wih,
                     preferred_element_type=jnp.float32) + b_gi      # (S*Bp, 3H) f32

        # Hoisted loop-invariant broadcast (JAX does not CSE broadcast_in_dim).
        b_hn_b = jnp.broadcast_to(b_hn, (batch_pad, H))

        h = jnp.zeros((batch_pad, H), jnp.float32)     # h0 = zeros (PyTorch semantics)
        hs = []
        for t in range(seq_len):                       # statically unrolled recurrence
            gi_t = gi[t * batch_pad:(t + 1) * batch_pad, :]          # 8-sublane aligned slice
            # Single fused MXU dot on the serial chain (bf16 operands, f32 acc).
            gh = jnp.dot(h.astype(jnp.bfloat16), whh,
                         preferred_element_type=jnp.float32)         # (Bp, 3H) f32
            # Fused r/z sigmoid over one (Bp, 2H) slab -> one EUP issue.
            rz = jax.nn.sigmoid(gi_t[:, :2 * H] + gh[:, :2 * H])
            r = rz[:, :H]
            z = rz[:, H:]
            n = jnp.tanh(gi_t[:, 2 * H:] + r * (gh[:, 2 * H:] + b_hn_b))
            h = (1.0 - z) * n + z * h
            hs.append(h)

        if last:
            hs_last = hs
        else:
            # Keep the whole (S*Bp, H) sequence in vregs; no VMEM round-trip.
            cur = jnp.concatenate(hs, axis=0)

    # FC head, off the serial chain: out[b] = sum_{t,h} h_t[b,h] * fcw[t,h] + fcb.
    acc = jnp.zeros((batch_pad, H), jnp.float32)
    for t in range(seq_len):
        acc = acc + hs_last[t] * fcw_ref[t]            # (Bp, H) * (Bp, H), tile-aligned load
    o_ref[...] = (jnp.sum(acc, axis=-1, keepdims=True) + fcb_ref[...]).astype(o_ref.dtype)


# ----------------------------------------------------------------------------
# Wrappers
# ----------------------------------------------------------------------------
def pack_params(params, sequence_length):
    """Repack math-layout params into the fused kernel's layout (done once)."""
    packed_layers = []
    for (w_ih, w_hh, b_ih, b_hh) in params["gru_layers"]:
        H = w_hh.shape[0]
        wih = w_ih.astype(jnp.bfloat16)                            # (in, 3H) fused r|z|n
        whh = w_hh.astype(jnp.bfloat16)                            # (H, 3H)  fused r|z|n
        b_gi = jnp.concatenate(
            [b_ih[:, :2 * H] + b_hh[:, :2 * H],                    # r, z: fold both biases
             b_ih[:, 2 * H:]], axis=1).astype(jnp.float32)         # n: input bias only
        b_hn = b_hh[:, 2 * H:].astype(jnp.float32)                 # n: hidden bias (inside r*)
        packed_layers.append((wih, whh, b_gi, b_hn))
    H = params["gru_layers"][-1][1].shape[0]
    fcw = params["fc_w"].reshape(sequence_length, H).astype(jnp.float32)  # row t multiplies h_t
    fcb = params["fc_b"].reshape(1, 1).astype(jnp.float32)
    return {"layers": packed_layers, "fc_w": fcw, "fc_b": fcb}


def gru_model_forward(x, packed):
    """Equivalent of GRU.forward(x): x (B, S, I) -> (B, 1)."""
    B, S, I = x.shape
    H = packed["layers"][-1][1].shape[0]
    num_layers = len(packed["layers"])

    # Pad batch to a multiple of 8 so every per-step slab is sublane-aligned
    # and the MXU M dimension is filled. Padded rows compute harmless garbage.
    Bp = max(8, ((B + 7) // 8) * 8)
    x_pad = jnp.zeros((Bp, S, I), x.dtype).at[:B].set(x)

    # Time-major flattened input: row t*Bp + b corresponds to (batch b, step t).
    x2d = jnp.transpose(x_pad, (1, 0, 2)).reshape(S * Bp, I)

    # FC weight pre-broadcast over the (padded) batch: no in-kernel broadcasts.
    fcw_b = jnp.broadcast_to(packed["fc_w"][:, None, :], (S, Bp, H))

    inputs = [x2d]
    for (wih, whh, b_gi, b_hn) in packed["layers"]:
        inputs += [wih, whh, b_gi, b_hn]
    inputs += [fcw_b, packed["fc_b"]]

    kernel = functools.partial(_fused_gru_fc_kernel, num_layers, S, Bp)
    out_pad = pl.pallas_call(
        kernel,
        out_shape=jax.ShapeDtypeStruct((Bp, 1), jnp.float32),
        in_specs=[pl.BlockSpec(memory_space=pltpu.MemorySpace.VMEM)] * len(inputs),
        out_specs=pl.BlockSpec(memory_space=pltpu.MemorySpace.VMEM),
    )(*inputs)
    return out_pad[:B]


# ----------------------------------------------------------------------------
# Deterministic parameter init (matches nn.GRU / nn.Linear shapes; synthetic)
# ----------------------------------------------------------------------------
def init_params(key, input_size, hidden_size, sequence_length, num_layers):
    H = hidden_size
    bound = 1.0 / np.sqrt(H)
    layers = []
    for layer in range(num_layers):
        in_sz = input_size if layer == 0 else H
        key, k1, k2, k3, k4 = jax.random.split(key, 5)
        # stored pre-transposed for x @ W : (in, 3H), gate order r, z, n
        w_ih = jax.random.uniform(k1, (in_sz, 3 * H), jnp.float32, -bound, bound)
        w_hh = jax.random.uniform(k2, (H, 3 * H), jnp.float32, -bound, bound)
        b_ih = jax.random.uniform(k3, (1, 3 * H), jnp.float32, -bound, bound)
        b_hh = jax.random.uniform(k4, (1, 3 * H), jnp.float32, -bound, bound)
        layers.append((w_ih, w_hh, b_ih, b_hh))
    key, k5, k6 = jax.random.split(key, 3)
    F = H * sequence_length
    fb = 1.0 / np.sqrt(F)
    fc_w = jax.random.uniform(k5, (F, 1), jnp.float32, -fb, fb)
    fc_b = jax.random.uniform(k6, (1, 1), jnp.float32, -fb, fb)
    return {"gru_layers": layers, "fc_w": fc_w, "fc_b": fc_b}


# ----------------------------------------------------------------------------
# Pure-JAX reference (for correctness check, full f32)
# ----------------------------------------------------------------------------
def gru_model_reference(x, params):
    B, S, _ = x.shape
    seq = x  # (B, S, I)
    for (w_ih, w_hh, b_ih, b_hh) in params["gru_layers"]:
        H = w_hh.shape[0]
        h0 = jnp.zeros((B, H), jnp.float32)

        def step(h, x_t):
            gi = x_t @ w_ih + b_ih
            gh = h @ w_hh + b_hh
            r = jax.nn.sigmoid(gi[:, :H] + gh[:, :H])
            z = jax.nn.sigmoid(gi[:, H:2 * H] + gh[:, H:2 * H])
            n = jnp.tanh(gi[:, 2 * H:] + r * gh[:, 2 * H:])
            h_new = (1.0 - z) * n + z * h
            return h_new, h_new

        _, outs = lax.scan(step, h0, jnp.transpose(seq, (1, 0, 2)))
        seq = jnp.transpose(outs, (1, 0, 2))
    H = params["gru_layers"][-1][1].shape[0]
    flat = seq.reshape(B, S * H)
    return flat @ params["fc_w"] + params["fc_b"]


# ----------------------------------------------------------------------------
if __name__ == "__main__":
    batch = 2
    input_size = 4
    hidden_size = 32
    sequence_length = 8
    num_layers = 2

    key = jax.random.PRNGKey(0)
    key, kx, kp = jax.random.split(key, 3)
    x = jax.random.normal(kx, (batch, sequence_length, input_size), jnp.float32)
    params = init_params(kp, input_size, hidden_size, sequence_length, num_layers)
    packed = pack_params(params, sequence_length)

    out = jax.block_until_ready(gru_model_forward(x, packed))
    assert out.shape == (batch, 1), out.shape

    ref = jax.block_until_ready(gru_model_reference(x, params))
    # Tolerance widened slightly vs. a pure-f32 check because the MXU operands
    # are bf16 (f32 accumulation); typical deviation is ~1e-3.
    np.testing.assert_allclose(np.asarray(out), np.asarray(ref), rtol=2e-2, atol=2e-2)

    print("KERNEL_OK")
</pallas_src>

<mosaic_0001>
module attributes {stable_mosaic.version = 11 : i64} {
  func.func @_fused_gru_fc_kernel(%arg0: memref<64x4xf32, #tpu.memory_space<vmem>>, %arg1: memref<4x96xbf16, #tpu.memory_space<vmem>>, %arg2: memref<32x96xbf16, #tpu.memory_space<vmem>>, %arg3: memref<1x96xf32, #tpu.memory_space<vmem>>, %arg4: memref<1x32xf32, #tpu.memory_space<vmem>>, %arg5: memref<32x96xbf16, #tpu.memory_space<vmem>>, %arg6: memref<32x96xbf16, #tpu.memory_space<vmem>>, %arg7: memref<1x96xf32, #tpu.memory_space<vmem>>, %arg8: memref<1x32xf32, #tpu.memory_space<vmem>>, %arg9: memref<8x8x32xf32, #tpu.memory_space<vmem>>, %arg10: memref<1x1xf32, #tpu.memory_space<vmem>>, %arg11: memref<8x1xf32, #tpu.memory_space<vmem>>) attributes {dimension_semantics = [], scalar_prefetch = 0 : i64, scratch_operands = 0 : i64, tpu.core_type = #tpu.core_type<tc>} {
    %c0 = arith.constant 0 : index
    %c0_0 = arith.constant 0 : index
    %0 = vector.load %arg0[%c0, %c0_0] : memref<64x4xf32, #tpu.memory_space<vmem>>, vector<64x4xf32>
    %c0_1 = arith.constant 0 : index
    %c0_2 = arith.constant 0 : index
    %1 = vector.load %arg1[%c0_1, %c0_2] : memref<4x96xbf16, #tpu.memory_space<vmem>>, vector<4x96xbf16>
    %c0_3 = arith.constant 0 : index
    %c0_4 = arith.constant 0 : index
    %2 = vector.load %arg2[%c0_3, %c0_4] : memref<32x96xbf16, #tpu.memory_space<vmem>>, vector<32x96xbf16>
    %c0_5 = arith.constant 0 : index
    %c0_6 = arith.constant 0 : index
    %3 = vector.load %arg3[%c0_5, %c0_6] : memref<1x96xf32, #tpu.memory_space<vmem>>, vector<1x96xf32>
    %c0_7 = arith.constant 0 : index
    %c0_8 = arith.constant 0 : index
    %4 = vector.load %arg4[%c0_7, %c0_8] : memref<1x32xf32, #tpu.memory_space<vmem>>, vector<1x32xf32>
    %5 = arith.truncf %0 : vector<64x4xf32> to vector<64x4xbf16>
    %cst = arith.constant dense<0.000000e+00> : vector<64x96xf32>
    %6 = tpu.matmul %5, %1, %cst {dimension_numbers = #tpu.dot_dimension_numbers<[1], [0], [0], [1], [0, 0, 1, 1], [], []>} : vector<64x4xbf16>, vector<4x96xbf16>, vector<64x96xf32> -> vector<64x96xf32>
    %7 = vector.broadcast %3 : vector<1x96xf32> to vector<64x96xf32>
    %8 = arith.addf %6, %7 : vector<64x96xf32>
    %9 = vector.shape_cast %4 : vector<1x32xf32> to vector<1x32xf32>
    %10 = vector.broadcast %9 : vector<1x32xf32> to vector<8x32xf32>
    %cst_9 = arith.constant 0.000000e+00 : f32
    %11 = vector.broadcast %cst_9 : f32 to vector<8x32xf32>
    %12 = vector.extract_strided_slice %8 {offsets = [0, 0], sizes = [8, 96], strides = [1, 1]} : vector<64x96xf32> to vector<8x96xf32>
    %13 = arith.truncf %11 : vector<8x32xf32> to vector<8x32xbf16>
    %cst_10 = arith.constant dense<0.000000e+00> : vector<8x96xf32>
    %14 = tpu.matmul %13, %2, %cst_10 {dimension_numbers = #tpu.dot_dimension_numbers<[1], [0], [0], [1], [0, 0, 1, 1], [], []>} : vector<8x32xbf16>, vector<32x96xbf16>, vector<8x96xf32> -> vector<8x96xf32>
    %15 = vector.extract_strided_slice %12 {offsets = [0, 0], sizes = [8, 64], strides = [1, 1]} : vector<8x96xf32> to vector<8x64xf32>
    %16 = vector.extract_strided_slice %14 {offsets = [0, 0], sizes = [8, 64], strides = [1, 1]} : vector<8x96xf32> to vector<8x64xf32>
    %17 = arith.addf %15, %16 : vector<8x64xf32>
    %18 = arith.negf %17 : vector<8x64xf32>
    %19 = math.exp %18 : vector<8x64xf32>
    %cst_11 = arith.constant 1.000000e+00 : f32
    %20 = vector.broadcast %cst_11 : f32 to vector<8x64xf32>
    %21 = arith.addf %20, %19 : vector<8x64xf32>
    %22 = arith.divf %20, %21 : vector<8x64xf32>
    %23 = vector.extract_strided_slice %22 {offsets = [0, 0], sizes = [8, 32], strides = [1, 1]} : vector<8x64xf32> to vector<8x32xf32>
    %24 = vector.extract_strided_slice %22 {offsets = [0, 32], sizes = [8, 32], strides = [1, 1]} : vector<8x64xf32> to vector<8x32xf32>
    %25 = vector.extract_strided_slice %12 {offsets = [0, 64], sizes = [8, 32], strides = [1, 1]} : vector<8x96xf32> to vector<8x32xf32>
    %26 = vector.extract_strided_slice %14 {offsets = [0, 64], sizes = [8, 32], strides = [1, 1]} : vector<8x96xf32> to vector<8x32xf32>
    %27 = arith.addf %26, %10 : vector<8x32xf32>
    %28 = arith.mulf %23, %27 : vector<8x32xf32>
    %29 = arith.addf %25, %28 : vector<8x32xf32>
    %30 = math.tanh %29 : vector<8x32xf32>
    %cst_12 = arith.constant 1.000000e+00 : f32
    %31 = vector.broadcast %cst_12 : f32 to vector<8x32xf32>
    %32 = arith.subf %31, %24 : vector<8x32xf32>
    %33 = arith.mulf %32, %30 : vector<8x32xf32>
    %34 = arith.mulf %24, %11 : vector<8x32xf32>
    %35 = arith.addf %33, %34 : vector<8x32xf32>
    %36 = vector.extract_strided_slice %8 {offsets = [8, 0], sizes = [8, 96], strides = [1, 1]} : vector<64x96xf32> to vector<8x96xf32>
    %37 = arith.truncf %35 : vector<8x32xf32> to vector<8x32xbf16>
    %cst_13 = arith.constant dense<0.000000e+00> : vector<8x96xf32>
    %38 = tpu.matmul %37, %2, %cst_13 {dimension_numbers = #tpu.dot_dimension_numbers<[1], [0], [0], [1], [0, 0, 1, 1], [], []>} : vector<8x32xbf16>, vector<32x96xbf16>, vector<8x96xf32> -> vector<8x96xf32>
    %39 = vector.extract_strided_slice %36 {offsets = [0, 0], sizes = [8, 64], strides = [1, 1]} : vector<8x96xf32> to vector<8x64xf32>
    %40 = vector.extract_strided_slice %38 {offsets = [0, 0], sizes = [8, 64], strides = [1, 1]} : vector<8x96xf32> to vector<8x64xf32>
    %41 = arith.addf %39, %40 : vector<8x64xf32>
    %42 = arith.negf %41 : vector<8x64xf32>
    %43 = math.exp %42 : vector<8x64xf32>
    %cst_14 = arith.constant 1.000000e+00 : f32
    %44 = vector.broadcast %cst_14 : f32 to vector<8x64xf32>
    %45 = arith.addf %44, %43 : vector<8x64xf32>
    %46 = arith.divf %44, %45 : vector<8x64xf32>
    %47 = vector.extract_strided_slice %46 {offsets = [0, 0], sizes = [8, 32], strides = [1, 1]} : vector<8x64xf32> to vector<8x32xf32>
    %48 = vector.extract_strided_slice %46 {offsets = [0, 32], sizes = [8, 32], strides = [1, 1]} : vector<8x64xf32> to vector<8x32xf32>
    %49 = vector.extract_strided_slice %36 {offsets = [0, 64], sizes = [8, 32], strides = [1, 1]} : vector<8x96xf32> to vector<8x32xf32>
    %50 = vector.extract_strided_slice %38 {offsets = [0, 64], sizes = [8, 32], strides = [1, 1]} : vector<8x96xf32> to vector<8x32xf32>
    %51 = arith.addf %50, %10 : vector<8x32xf32>
    %52 = arith.mulf %47, %51 : vector<8x32xf32>
    %53 = arith.addf %49, %52 : vector<8x32xf32>
    %54 = math.tanh %53 : vector<8x32xf32>
    %cst_15 = arith.constant 1.000000e+00 : f32
    %55 = vector.broadcast %cst_15 : f32 to vector<8x32xf32>
    %56 = arith.subf %55, %48 : vector<8x32xf32>
    %57 = arith.mulf %56, %54 : vector<8x32xf32>
    %58 = arith.mulf %48, %35 : vector<8x32xf32>
    %59 = arith.addf %57, %58 : vector<8x32xf32>
    %60 = vector.extract_strided_slice %8 {offsets = [16, 0], sizes = [8, 96], strides = [1, 1]} : vector<64x96xf32> to vector<8x96xf32>
    %61 = arith.truncf %59 : vector<8x32xf32> to vector<8x32xbf16>
    %cst_16 = arith.constant dense<0.000000e+00> : vector<8x96xf32>
    %62 = tpu.matmul %61, %2, %cst_16 {dimension_numbers = #tpu.dot_dimension_numbers<[1], [0], [0], [1], [0, 0, 1, 1], [], []>} : vector<8x32xbf16>, vector<32x96xbf16>, vector<8x96xf32> -> vector<8x96xf32>
    %63 = vector.extract_strided_slice %60 {offsets = [0, 0], sizes = [8, 64], strides = [1, 1]} : vector<8x96xf32> to vector<8x64xf32>
    %64 = vector.extract_strided_slice %62 {offsets = [0, 0], sizes = [8, 64], strides = [1, 1]} : vector<8x96xf32> to vector<8x64xf32>
    %65 = arith.addf %63, %64 : vector<8x64xf32>
    %66 = arith.negf %65 : vector<8x64xf32>
    %67 = math.exp %66 : vector<8x64xf32>
    %cst_17 = arith.constant 1.000000e+00 : f32
    %68 = vector.broadcast %cst_17 : f32 to vector<8x64xf32>
    %69 = arith.addf %68, %67 : vector<8x64xf32>
    %70 = arith.divf %68, %69 : vector<8x64xf32>
    %71 = vector.extract_strided_slice %70 {offsets = [0, 0], sizes = [8, 32], strides = [1, 1]} : vector<8x64xf32> to vector<8x32xf32>
    %72 = vector.extract_strided_slice %70 {offsets = [0, 32], sizes = [8, 32], strides = [1, 1]} : vector<8x64xf32> to vector<8x32xf32>
    %73 = vector.extract_strided_slice %60 {offsets = [0, 64], sizes = [8, 32], strides = [1, 1]} : vector<8x96xf32> to vector<8x32xf32>
    %74 = vector.extract_strided_slice %62 {offsets = [0, 64], sizes = [8, 32], strides = [1, 1]} : vector<8x96xf32> to vector<8x32xf32>
    %75 = arith.addf %74, %10 : vector<8x32xf32>
    %76 = arith.mulf %71, %75 : vector<8x32xf32>
    %77 = arith.addf %73, %76 : vector<8x32xf32>
    %78 = math.tanh %77 : vector<8x32xf32>
    %cst_18 = arith.constant 1.000000e+00 : f32
    %79 = vector.broadcast %cst_18 : f32 to vector<8x32xf32>
    %80 = arith.subf %79, %72 : vector<8x32xf32>
    %81 = arith.mulf %80, %78 : vector<8x32xf32>
    %82 = arith.mulf %72, %59 : vector<8x32xf32>
    %83 = arith.addf %81, %82 : vector<8x32xf32>
    %84 = vector.extract_strided_slice %8 {offsets = [24, 0], sizes = [8, 96], strides = [1, 1]} : vector<64x96xf32> to vector<8x96xf32>
    %85 = arith.truncf %83 : vector<8x32xf32> to vector<8x32xbf16>
    %cst_19 = arith.constant dense<0.000000e+00> : vector<8x96xf32>
    %86 = tpu.matmul %85, %2, %cst_19 {dimension_numbers = #tpu.dot_dimension_numbers<[1], [0], [0], [1], [0, 0, 1, 1], [], []>} : vector<8x32xbf16>, vector<32x96xbf16>, vector<8x96xf32> -> vector<8x96xf32>
    %87 = vector.extract_strided_slice %84 {offsets = [0, 0], sizes = [8, 64], strides = [1, 1]} : vector<8x96xf32> to vector<8x64xf32>
    %88 = vector.extract_strided_slice %86 {offsets = [0, 0], sizes = [8, 64], strides = [1, 1]} : vector<8x96xf32> to vector<8x64xf32>
    %89 = arith.addf %87, %88 : vector<8x64xf32>
    %90 = arith.negf %89 : vector<8x64xf32>
    %91 = math.exp %90 : vector<8x64xf32>
    %cst_20 = arith.constant 1.000000e+00 : f32
    %92 = vector.broadcast %cst_20 : f32 to vector<8x64xf32>
    %93 = arith.addf %92, %91 : vector<8x64xf32>
    %94 = arith.divf %92, %93 : vector<8x64xf32>
    %95 = vector.extract_strided_slice %94 {offsets = [0, 0], sizes = [8, 32], strides = [1, 1]} : vector<8x64xf32> to vector<8x32xf32>
    %96 = vector.extract_strided_slice %94 {offsets = [0, 32], sizes = [8, 32], strides = [1, 1]} : vector<8x64xf32> to vector<8x32xf32>
    %97 = vector.extract_strided_slice %84 {offsets = [0, 64], sizes = [8, 32], strides = [1, 1]} : vector<8x96xf32> to vector<8x32xf32>
    %98 = vector.extract_strided_slice %86 {offsets = [0, 64], sizes = [8, 32], strides = [1, 1]} : vector<8x96xf32> to vector<8x32xf32>
    %99 = arith.addf %98, %10 : vector<8x32xf32>
    %100 = arith.mulf %95, %99 : vector<8x32xf32>
    %101 = arith.addf %97, %100 : vector<8x32xf32>
    %102 = math.tanh %101 : vector<8x32xf32>
    %cst_21 = arith.constant 1.000000e+00 : f32
    %103 = vector.broadcast %cst_21 : f32 to vector<8x32xf32>
    %104 = arith.subf %103, %96 : vector<8x32xf32>
    %105 = arith.mulf %104, %102 : vector<8x32xf32>
    %106 = arith.mulf %96, %83 : vector<8x32xf32>
    %107 = arith.addf %105, %106 : vector<8x32xf32>
    %108 = vector.extract_strided_slice %8 {offsets = [32, 0], sizes = [8, 96], strides = [1, 1]} : vector<64x96xf32> to vector<8x96xf32>
    %109 = arith.truncf %107 : vector<8x32xf32> to vector<8x32xbf16>
    %cst_22 = arith.constant dense<0.000000e+00> : vector<8x96xf32>
    %110 = tpu.matmul %109, %2, %cst_22 {dimension_numbers = #tpu.dot_dimension_numbers<[1], [0], [0], [1], [0, 0, 1, 1], [], []>} : vector<8x32xbf16>, vector<32x96xbf16>, vector<8x96xf32> -> vector<8x96xf32>
    %111 = vector.extract_strided_slice %108 {offsets = [0, 0], sizes = [8, 64], strides = [1, 1]} : vector<8x96xf32> to vector<8x64xf32>
    %112 = vector.extract_strided_slice %110 {offsets = [0, 0], sizes = [8, 64], strides = [1, 1]} : vector<8x96xf32> to vector<8x64xf32>
    %113 = arith.addf %111, %112 : vector<8x64xf32>
    %114 = arith.negf %113 : vector<8x64xf32>
    %115 = math.exp %114 : vector<8x64xf32>
    %cst_23 = arith.constant 1.000000e+00 : f32
    %116 = vector.broadcast %cst_23 : f32 to vector<8x64xf32>
    %117 = arith.addf %116, %115 : vector<8x64xf32>
    %118 = arith.divf %116, %117 : vector<8x64xf32>
    %119 = vector.extract_strided_slice %118 {offsets = [0, 0], sizes = [8, 32], strides = [1, 1]} : vector<8x64xf32> to vector<8x32xf32>
    %120 = vector.extract_strided_slice %118 {offsets = [0, 32], sizes = [8, 32], strides = [1, 1]} : vector<8x64xf32> to vector<8x32xf32>
    %121 = vector.extract_strided_slice %108 {offsets = [0, 64], sizes = [8, 32], strides = [1, 1]} : vector<8x96xf32> to vector<8x32xf32>
    %122 = vector.extract_strided_slice %110 {offsets = [0, 64], sizes = [8, 32], strides = [1, 1]} : vector<8x96xf32> to vector<8x32xf32>
    %123 = arith.addf %122, %10 : vector<8x32xf32>
    %124 = arith.mulf %119, %123 : vector<8x32xf32>
    %125 = arith.addf %121, %124 : vector<8x32xf32>
    %126 = math.tanh %125 : vector<8x32xf32>
    %cst_24 = arith.constant 1.000000e+00 : f32
    %127 = vector.broadcast %cst_24 : f32 to vector<8x32xf32>
    %128 = arith.subf %127, %120 : vector<8x32xf32>
    %129 = arith.mulf %128, %126 : vector<8x32xf32>
    %130 = arith.mulf %120, %107 : vector<8x32xf32>
    %131 = arith.addf %129, %130 : vector<8x32xf32>
    %132 = vector.extract_strided_slice %8 {offsets = [40, 0], sizes = [8, 96], strides = [1, 1]} : vector<64x96xf32> to vector<8x96xf32>
    %133 = arith.truncf %131 : vector<8x32xf32> to vector<8x32xbf16>
    %cst_25 = arith.constant dense<0.000000e+00> : vector<8x96xf32>
    %134 = tpu.matmul %133, %2, %cst_25 {dimension_numbers = #tpu.dot_dimension_numbers<[1], [0], [0], [1], [0, 0, 1, 1], [], []>} : vector<8x32xbf16>, vector<32x96xbf16>, vector<8x96xf32> -> vector<8x96xf32>
    %135 = vector.extract_strided_slice %132 {offsets = [0, 0], sizes = [8, 64], strides = [1, 1]} : vector<8x96xf32> to vector<8x64xf32>
    %136 = vector.extract_strided_slice %134 {offsets = [0, 0], sizes = [8, 64], strides = [1, 1]} : vector<8x96xf32> to vector<8x64xf32>
    %137 = arith.addf %135, %136 : vector<8x64xf32>
    %138 = arith.negf %137 : vector<8x64xf32>
    %139 = math.exp %138 : vector<8x64xf32>
    %cst_26 = arith.constant 1.000000e+00 : f32
    %140 = vector.broadcast %cst_26 : f32 to vector<8x64xf32>
    %141 = arith.addf %140, %139 : vector<8x64xf32>
    %142 = arith.divf %140, %141 : vector<8x64xf32>
    %143 = vector.extract_strided_slice %142 {offsets = [0, 0], sizes = [8, 32], strides = [1, 1]} : vector<8x64xf32> to vector<8x32xf32>
    %144 = vector.extract_strided_slice %142 {offsets = [0, 32], sizes = [8, 32], strides = [1, 1]} : vector<8x64xf32> to vector<8x32xf32>
    %145 = vector.extract_strided_slice %132 {offsets = [0, 64], sizes = [8, 32], strides = [1, 1]} : vector<8x96xf32> to vector<8x32xf32>
    %146 = vector.extract_strided_slice %134 {offsets = [0, 64], sizes = [8, 32], strides = [1, 1]} : vector<8x96xf32> to vector<8x32xf32>
    %147 = arith.addf %146, %10 : vector<8x32xf32>
    %148 = arith.mulf %143, %147 : vector<8x32xf32>
    %149 = arith.addf %145, %148 : vector<8x32xf32>
    %150 = math.tanh %149 : vector<8x32xf32>
    %cst_27 = arith.constant 1.000000e+00 : f32
    %151 = vector.broadcast %cst_27 : f32 to vector<8x32xf32>
    %152 = arith.subf %151, %144 : vector<8x32xf32>
    %153 = arith.mulf %152, %150 : vector<8x32xf32>
    %154 = arith.mulf %144, %131 : vector<8x32xf32>
    %155 = arith.addf %153, %154 : vector<8x32xf32>
    %156 = vector.extract_strided_slice %8 {offsets = [48, 0], sizes = [8, 96], strides = [1, 1]} : vector<64x96xf32> to vector<8x96xf32>
    %157 = arith.truncf %155 : vector<8x32xf32> to vector<8x32xbf16>
    %cst_28 = arith.constant dense<0.000000e+00> : vector<8x96xf32>
    %158 = tpu.matmul %157, %2, %cst_28 {dimension_numbers = #tpu.dot_dimension_numbers<[1], [0], [0], [1], [0, 0, 1, 1], [], []>} : vector<8x32xbf16>, vector<32x96xbf16>, vector<8x96xf32> -> vector<8x96xf32>
    %159 = vector.extract_strided_slice %156 {offsets = [0, 0], sizes = [8, 64], strides = [1, 1]} : vector<8x96xf32> to vector<8x64xf32>
    %160 = vector.extract_strided_slice %158 {offsets = [0, 0], sizes = [8, 64], strides = [1, 1]} : vector<8x96xf32> to vector<8x64xf32>
    %161 = arith.addf %159, %160 : vector<8x64xf32>
    %162 = arith.negf %161 : vector<8x64xf32>
    %163 = math.exp %162 : vector<8x64xf32>
    %cst_29 = arith.constant 1.000000e+00 : f32
    %164 = vector.broadcast %cst_29 : f32 to vector<8x64xf32>
    %165 = arith.addf %164, %163 : vector<8x64xf32>
    %166 = arith.divf %164, %165 : vector<8x64xf32>
    %167 = vector.extract_strided_slice %166 {offsets = [0, 0], sizes = [8, 32], strides = [1, 1]} : vector<8x64xf32> to vector<8x32xf32>
    %168 = vector.extract_strided_slice %166 {offsets = [0, 32], sizes = [8, 32], strides = [1, 1]} : vector<8x64xf32> to vector<8x32xf32>
    %169 = vector.extract_strided_slice %156 {offsets = [0, 64], sizes = [8, 32], strides = [1, 1]} : vector<8x96xf32> to vector<8x32xf32>
    %170 = vector.extract_strided_slice %158 {offsets = [0, 64], sizes = [8, 32], strides = [1, 1]} : vector<8x96xf32> to vector<8x32xf32>
    %171 = arith.addf %170, %10 : vector<8x32xf32>
    %172 = arith.mulf %167, %171 : vector<8x32xf32>
    %173 = arith.addf %169, %172 : vector<8x32xf32>
    %174 = math.tanh %173 : vector<8x32xf32>
    %cst_30 = arith.constant 1.000000e+00 : f32
    %175 = vector.broadcast %cst_30 : f32 to vector<8x32xf32>
    %176 = arith.subf %175, %168 : vector<8x32xf32>
    %177 = arith.mulf %176, %174 : vector<8x32xf32>
    %178 = arith.mulf %168, %155 : vector<8x32xf32>
    %179 = arith.addf %177, %178 : vector<8x32xf32>
    %180 = vector.extract_strided_slice %8 {offsets = [56, 0], sizes = [8, 96], strides = [1, 1]} : vector<64x96xf32> to vector<8x96xf32>
    %181 = arith.truncf %179 : vector<8x32xf32> to vector<8x32xbf16>
    %cst_31 = arith.constant dense<0.000000e+00> : vector<8x96xf32>
    %182 = tpu.matmul %181, %2, %cst_31 {dimension_numbers = #tpu.dot_dimension_numbers<[1], [0], [0], [1], [0, 0, 1, 1], [], []>} : vector<8x32xbf16>, vector<32x96xbf16>, vector<8x96xf32> -> vector<8x96xf32>
    %183 = vector.extract_strided_slice %180 {offsets = [0, 0], sizes = [8, 64], strides = [1, 1]} : vector<8x96xf32> to vector<8x64xf32>
    %184 = vector.extract_strided_slice %182 {offsets = [0, 0], sizes = [8, 64], strides = [1, 1]} : vector<8x96xf32> to vector<8x64xf32>
    %185 = arith.addf %183, %184 : vector<8x64xf32>
    %186 = arith.negf %185 : vector<8x64xf32>
    %187 = math.exp %186 : vector<8x64xf32>
    %cst_32 = arith.constant 1.000000e+00 : f32
    %188 = vector.broadcast %cst_32 : f32 to vector<8x64xf32>
    %189 = arith.addf %188, %187 : vector<8x64xf32>
    %190 = arith.divf %188, %189 : vector<8x64xf32>
    %191 = vector.extract_strided_slice %190 {offsets = [0, 0], sizes = [8, 32], strides = [1, 1]} : vector<8x64xf32> to vector<8x32xf32>
    %192 = vector.extract_strided_slice %190 {offsets = [0, 32], sizes = [8, 32], strides = [1, 1]} : vector<8x64xf32> to vector<8x32xf32>
    %193 = vector.extract_strided_slice %180 {offsets = [0, 64], sizes = [8, 32], strides = [1, 1]} : vector<8x96xf32> to vector<8x32xf32>
    %194 = vector.extract_strided_slice %182 {offsets = [0, 64], sizes = [8, 32], strides = [1, 1]} : vector<8x96xf32> to vector<8x32xf32>
    %195 = arith.addf %194, %10 : vector<8x32xf32>
    %196 = arith.mulf %191, %195 : vector<8x32xf32>
    %197 = arith.addf %193, %196 : vector<8x32xf32>
    %198 = math.tanh %197 : vector<8x32xf32>
    %cst_33 = arith.constant 1.000000e+00 : f32
    %199 = vector.broadcast %cst_33 : f32 to vector<8x32xf32>
    %200 = arith.subf %199, %192 : vector<8x32xf32>
    %201 = arith.mulf %200, %198 : vector<8x32xf32>
    %202 = arith.mulf %192, %179 : vector<8x32xf32>
    %203 = arith.addf %201, %202 : vector<8x32xf32>
    %204 = tpu.concatenate %35, %59, %83, %107, %131, %155, %179, %203 in 0 : vector<8x32xf32>, vector<8x32xf32>, vector<8x32xf32>, vector<8x32xf32>, vector<8x32xf32>, vector<8x32xf32>, vector<8x32xf32>, vector<8x32xf32> -> vector<64x32xf32>
    %c0_34 = arith.constant 0 : index
    %c0_35 = arith.constant 0 : index
    %205 = vector.load %arg5[%c0_34, %c0_35] : memref<32x96xbf16, #tpu.memory_space<vmem>>, vector<32x96xbf16>
    %c0_36 = arith.constant 0 : index
    %c0_37 = arith.constant 0 : index
    %206 = vector.load %arg6[%c0_36, %c0_37] : memref<32x96xbf16, #tpu.memory_space<vmem>>, vector<32x96xbf16>
    %c0_38 = arith.constant 0 : index
    %c0_39 = arith.constant 0 : index
    %207 = vector.load %arg7[%c0_38, %c0_39] : memref<1x96xf32, #tpu.memory_space<vmem>>, vector<1x96xf32>
    %c0_40 = arith.constant 0 : index
    %c0_41 = arith.constant 0 : index
    %208 = vector.load %arg8[%c0_40, %c0_41] : memref<1x32xf32, #tpu.memory_space<vmem>>, vector<1x32xf32>
    %209 = arith.truncf %204 : vector<64x32xf32> to vector<64x32xbf16>
    %cst_42 = arith.constant dense<0.000000e+00> : vector<64x96xf32>
    %210 = tpu.matmul %209, %205, %cst_42 {dimension_numbers = #tpu.dot_dimension_numbers<[1], [0], [0], [1], [0, 0, 1, 1], [], []>} : vector<64x32xbf16>, vector<32x96xbf16>, vector<64x96xf32> -> vector<64x96xf32>
    %211 = vector.broadcast %207 : vector<1x96xf32> to vector<64x96xf32>
    %212 = arith.addf %210, %211 : vector<64x96xf32>
    %213 = vector.shape_cast %208 : vector<1x32xf32> to vector<1x32xf32>
    %214 = vector.broadcast %213 : vector<1x32xf32> to vector<8x32xf32>
    %cst_43 = arith.constant 0.000000e+00 : f32
    %215 = vector.broadcast %cst_43 : f32 to vector<8x32xf32>
    %216 = vector.extract_strided_slice %212 {offsets = [0, 0], sizes = [8, 96], strides = [1, 1]} : vector<64x96xf32> to vector<8x96xf32>
    %217 = arith.truncf %215 : vector<8x32xf32> to vector<8x32xbf16>
    %cst_44 = arith.constant dense<0.000000e+00> : vector<8x96xf32>
    %218 = tpu.matmul %217, %206, %cst_44 {dimension_numbers = #tpu.dot_dimension_numbers<[1], [0], [0], [1], [0, 0, 1, 1], [], []>} : vector<8x32xbf16>, vector<32x96xbf16>, vector<8x96xf32> -> vector<8x96xf32>
    %219 = vector.extract_strided_slice %216 {offsets = [0, 0], sizes = [8, 64], strides = [1, 1]} : vector<8x96xf32> to vector<8x64xf32>
    %220 = vector.extract_strided_slice %218 {offsets = [0, 0], sizes = [8, 64], strides = [1, 1]} : vector<8x96xf32> to vector<8x64xf32>
    %221 = arith.addf %219, %220 : vector<8x64xf32>
    %222 = arith.negf %221 : vector<8x64xf32>
    %223 = math.exp %222 : vector<8x64xf32>
    %cst_45 = arith.constant 1.000000e+00 : f32
    %224 = vector.broadcast %cst_45 : f32 to vector<8x64xf32>
    %225 = arith.addf %224, %223 : vector<8x64xf32>
    %226 = arith.divf %224, %225 : vector<8x64xf32>
    %227 = vector.extract_strided_slice %226 {offsets = [0, 0], sizes = [8, 32], strides = [1, 1]} : vector<8x64xf32> to vector<8x32xf32>
    %228 = vector.extract_strided_slice %226 {offsets = [0, 32], sizes = [8, 32], strides = [1, 1]} : vector<8x64xf32> to vector<8x32xf32>
    %229 = vector.extract_strided_slice %216 {offsets = [0, 64], sizes = [8, 32], strides = [1, 1]} : vector<8x96xf32> to vector<8x32xf32>
    %230 = vector.extract_strided_slice %218 {offsets = [0, 64], sizes = [8, 32], strides = [1, 1]} : vector<8x96xf32> to vector<8x32xf32>
    %231 = arith.addf %230, %214 : vector<8x32xf32>
    %232 = arith.mulf %227, %231 : vector<8x32xf32>
    %233 = arith.addf %229, %232 : vector<8x32xf32>
    %234 = math.tanh %233 : vector<8x32xf32>
    %cst_46 = arith.constant 1.000000e+00 : f32
    %235 = vector.broadcast %cst_46 : f32 to vector<8x32xf32>
    %236 = arith.subf %235, %228 : vector<8x32xf32>
    %237 = arith.mulf %236, %234 : vector<8x32xf32>
    %238 = arith.mulf %228, %215 : vector<8x32xf32>
    %239 = arith.addf %237, %238 : vector<8x32xf32>
    %240 = vector.extract_strided_slice %212 {offsets = [8, 0], sizes = [8, 96], strides = [1, 1]} : vector<64x96xf32> to vector<8x96xf32>
    %241 = arith.truncf %239 : vector<8x32xf32> to vector<8x32xbf16>
    %cst_47 = arith.constant dense<0.000000e+00> : vector<8x96xf32>
    %242 = tpu.matmul %241, %206, %cst_47 {dimension_numbers = #tpu.dot_dimension_numbers<[1], [0], [0], [1], [0, 0, 1, 1], [], []>} : vector<8x32xbf16>, vector<32x96xbf16>, vector<8x96xf32> -> vector<8x96xf32>
    %243 = vector.extract_strided_slice %240 {offsets = [0, 0], sizes = [8, 64], strides = [1, 1]} : vector<8x96xf32> to vector<8x64xf32>
    %244 = vector.extract_strided_slice %242 {offsets = [0, 0], sizes = [8, 64], strides = [1, 1]} : vector<8x96xf32> to vector<8x64xf32>
    %245 = arith.addf %243, %244 : vector<8x64xf32>
    %246 = arith.negf %245 : vector<8x64xf32>
    %247 = math.exp %246 : vector<8x64xf32>
    %cst_48 = arith.constant 1.000000e+00 : f32
    %248 = vector.broadcast %cst_48 : f32 to vector<8x64xf32>
    %249 = arith.addf %248, %247 : vector<8x64xf32>
    %250 = arith.divf %248, %249 : vector<8x64xf32>
    %251 = vector.extract_strided_slice %250 {offsets = [0, 0], sizes = [8, 32], strides = [1, 1]} : vector<8x64xf32> to vector<8x32xf32>
    %252 = vector.extract_strided_slice %250 {offsets = [0, 32], sizes = [8, 32], strides = [1, 1]} : vector<8x64xf32> to vector<8x32xf32>
    %253 = vector.extract_strided_slice %240 {offsets = [0, 64], sizes = [8, 32], strides = [1, 1]} : vector<8x96xf32> to vector<8x32xf32>
    %254 = vector.extract_strided_slice %242 {offsets = [0, 64], sizes = [8, 32], strides = [1, 1]} : vector<8x96xf32> to vector<8x32xf32>
    %255 = arith.addf %254, %214 : vector<8x32xf32>
    %256 = arith.mulf %251, %255 : vector<8x32xf32>
    %257 = arith.addf %253, %256 : vector<8x32xf32>
    %258 = math.tanh %257 : vector<8x32xf32>
    %cst_49 = arith.constant 1.000000e+00 : f32
    %259 = vector.broadcast %cst_49 : f32 to vector<8x32xf32>
    %260 = arith.subf %259, %252 : vector<8x32xf32>
    %261 = arith.mulf %260, %258 : vector<8x32xf32>
    %262 = arith.mulf %252, %239 : vector<8x32xf32>
    %263 = arith.addf %261, %262 : vector<8x32xf32>
    %264 = vector.extract_strided_slice %212 {offsets = [16, 0], sizes = [8, 96], strides = [1, 1]} : vector<64x96xf32> to vector<8x96xf32>
    %265 = arith.truncf %263 : vector<8x32xf32> to vector<8x32xbf16>
    %cst_50 = arith.constant dense<0.000000e+00> : vector<8x96xf32>
    %266 = tpu.matmul %265, %206, %cst_50 {dimension_numbers = #tpu.dot_dimension_numbers<[1], [0], [0], [1], [0, 0, 1, 1], [], []>} : vector<8x32xbf16>, vector<32x96xbf16>, vector<8x96xf32> -> vector<8x96xf32>
    %267 = vector.extract_strided_slice %264 {offsets = [0, 0], sizes = [8, 64], strides = [1, 1]} : vector<8x96xf32> to vector<8x64xf32>
    %268 = vector.extract_strided_slice %266 {offsets = [0, 0], sizes = [8, 64], strides = [1, 1]} : vector<8x96xf32> to vector<8x64xf32>
    %269 = arith.addf %267, %268 : vector<8x64xf32>
    %270 = arith.negf %269 : vector<8x64xf32>
    %271 = math.exp %270 : vector<8x64xf32>
    %cst_51 = arith.constant 1.000000e+00 : f32
    %272 = vector.broadcast %cst_51 : f32 to vector<8x64xf32>
    %273 = arith.addf %272, %271 : vector<8x64xf32>
    %274 = arith.divf %272, %273 : vector<8x64xf32>
    %275 = vector.extract_strided_slice %274 {offsets = [0, 0], sizes = [8, 32], strides = [1, 1]} : vector<8x64xf32> to vector<8x32xf32>
    %276 = vector.extract_strided_slice %274 {offsets = [0, 32], sizes = [8, 32], strides = [1, 1]} : vector<8x64xf32> to vector<8x32xf32>
    %277 = vector.extract_strided_slice %264 {offsets = [0, 64], sizes = [8, 32], strides = [1, 1]} : vector<8x96xf32> to vector<8x32xf32>
    %278 = vector.extract_strided_slice %266 {offsets = [0, 64], sizes = [8, 32], strides = [1, 1]} : vector<8x96xf32> to vector<8x32xf32>
    %279 = arith.addf %278, %214 : vector<8x32xf32>
    %280 = arith.mulf %275, %279 : vector<8x32xf32>
    %281 = arith.addf %277, %280 : vector<8x32xf32>
    %282 = math.tanh %281 : vector<8x32xf32>
    %cst_52 = arith.constant 1.000000e+00 : f32
    %283 = vector.broadcast %cst_52 : f32 to vector<8x32xf32>
    %284 = arith.subf %283, %276 : vector<8x32xf32>
    %285 = arith.mulf %284, %282 : vector<8x32xf32>
    %286 = arith.mulf %276, %263 : vector<8x32xf32>
    %287 = arith.addf %285, %286 : vector<8x32xf32>
    %288 = vector.extract_strided_slice %212 {offsets = [24, 0], sizes = [8, 96], strides = [1, 1]} : vector<64x96xf32> to vector<8x96xf32>
    %289 = arith.truncf %287 : vector<8x32xf32> to vector<8x32xbf16>
    %cst_53 = arith.constant dense<0.000000e+00> : vector<8x96xf32>
    %290 = tpu.matmul %289, %206, %cst_53 {dimension_numbers = #tpu.dot_dimension_numbers<[1], [0], [0], [1], [0, 0, 1, 1], [], []>} : vector<8x32xbf16>, vector<32x96xbf16>, vector<8x96xf32> -> vector<8x96xf32>
    %291 = vector.extract_strided_slice %288 {offsets = [0, 0], sizes = [8, 64], strides = [1, 1]} : vector<8x96xf32> to vector<8x64xf32>
    %292 = vector.extract_strided_slice %290 {offsets = [0, 0], sizes = [8, 64], strides = [1, 1]} : vector<8x96xf32> to vector<8x64xf32>
    %293 = arith.addf %291, %292 : vector<8x64xf32>
    %294 = arith.negf %293 : vector<8x64xf32>
    %295 = math.exp %294 : vector<8x64xf32>
    %cst_54 = arith.constant 1.000000e+00 : f32
    %296 = vector.broadcast %cst_54 : f32 to vector<8x64xf32>
    %297 = arith.addf %296, %295 : vector<8x64xf32>
    %298 = arith.divf %296, %297 : vector<8x64xf32>
    %299 = vector.extract_strided_slice %298 {offsets = [0, 0], sizes = [8, 32], strides = [1, 1]} : vector<8x64xf32> to vector<8x32xf32>
    %300 = vector.extract_strided_slice %298 {offsets = [0, 32], sizes = [8, 32], strides = [1, 1]} : vector<8x64xf32> to vector<8x32xf32>
    %301 = vector.extract_strided_slice %288 {offsets = [0, 64], sizes = [8, 32], strides = [1, 1]} : vector<8x96xf32> to vector<8x32xf32>
    %302 = vector.extract_strided_slice %290 {offsets = [0, 64], sizes = [8, 32], strides = [1, 1]} : vector<8x96xf32> to vector<8x32xf32>
    %303 = arith.addf %302, %214 : vector<8x32xf32>
    %304 = arith.mulf %299, %303 : vector<8x32xf32>
    %305 = arith.addf %301, %304 : vector<8x32xf32>
    %306 = math.tanh %305 : vector<8x32xf32>
    %cst_55 = arith.constant 1.000000e+00 : f32
    %307 = vector.broadcast %cst_55 : f32 to vector<8x32xf32>
    %308 = arith.subf %307, %300 : vector<8x32xf32>
    %309 = arith.mulf %308, %306 : vector<8x32xf32>
    %310 = arith.mulf %300, %287 : vector<8x32xf32>
    %311 = arith.addf %309, %310 : vector<8x32xf32>
    %312 = vector.extract_strided_slice %212 {offsets = [32, 0], sizes = [8, 96], strides = [1, 1]} : vector<64x96xf32> to vector<8x96xf32>
    %313 = arith.truncf %311 : vector<8x32xf32> to vector<8x32xbf16>
    %cst_56 = arith.constant dense<0.000000e+00> : vector<8x96xf32>
    %314 = tpu.matmul %313, %206, %cst_56 {dimension_numbers = #tpu.dot_dimension_numbers<[1], [0], [0], [1], [0, 0, 1, 1], [], []>} : vector<8x32xbf16>, vector<32x96xbf16>, vector<8x96xf32> -> vector<8x96xf32>
    %315 = vector.extract_strided_slice %312 {offsets = [0, 0], sizes = [8, 64], strides = [1, 1]} : vector<8x96xf32> to vector<8x64xf32>
    %316 = vector.extract_strided_slice %314 {offsets = [0, 0], sizes = [8, 64], strides = [1, 1]} : vector<8x96xf32> to vector<8x64xf32>
    %317 = arith.addf %315, %316 : vector<8x64xf32>
    %318 = arith.negf %317 : vector<8x64xf32>
    %319 = math.exp %318 : vector<8x64xf32>
    %cst_57 = arith.constant 1.000000e+00 : f32
    %320 = vector.broadcast %cst_57 : f32 to vector<8x64xf32>
    %321 = arith.addf %320, %319 : vector<8x64xf32>
    %322 = arith.divf %320, %321 : vector<8x64xf32>
    %323 = vector.extract_strided_slice %322 {offsets = [0, 0], sizes = [8, 32], strides = [1, 1]} : vector<8x64xf32> to vector<8x32xf32>
    %324 = vector.extract_strided_slice %322 {offsets = [0, 32], sizes = [8, 32], strides = [1, 1]} : vector<8x64xf32> to vector<8x32xf32>
    %325 = vector.extract_strided_slice %312 {offsets = [0, 64], sizes = [8, 32], strides = [1, 1]} : vector<8x96xf32> to vector<8x32xf32>
    %326 = vector.extract_strided_slice %314 {offsets = [0, 64], sizes = [8, 32], strides = [1, 1]} : vector<8x96xf32> to vector<8x32xf32>
    %327 = arith.addf %326, %214 : vector<8x32xf32>
    %328 = arith.mulf %323, %327 : vector<8x32xf32>
    %329 = arith.addf %325, %328 : vector<8x32xf32>
    %330 = math.tanh %329 : vector<8x32xf32>
    %cst_58 = arith.constant 1.000000e+00 : f32
    %331 = vector.broadcast %cst_58 : f32 to vector<8x32xf32>
    %332 = arith.subf %331, %324 : vector<8x32xf32>
    %333 = arith.mulf %332, %330 : vector<8x32xf32>
    %334 = arith.mulf %324, %311 : vector<8x32xf32>
    %335 = arith.addf %333, %334 : vector<8x32xf32>
    %336 = vector.extract_strided_slice %212 {offsets = [40, 0], sizes = [8, 96], strides = [1, 1]} : vector<64x96xf32> to vector<8x96xf32>
    %337 = arith.truncf %335 : vector<8x32xf32> to vector<8x32xbf16>
    %cst_59 = arith.constant dense<0.000000e+00> : vector<8x96xf32>
    %338 = tpu.matmul %337, %206, %cst_59 {dimension_numbers = #tpu.dot_dimension_numbers<[1], [0], [0], [1], [0, 0, 1, 1], [], []>} : vector<8x32xbf16>, vector<32x96xbf16>, vector<8x96xf32> -> vector<8x96xf32>
    %339 = vector.extract_strided_slice %336 {offsets = [0, 0], sizes = [8, 64], strides = [1, 1]} : vector<8x96xf32> to vector<8x64xf32>
    %340 = vector.extract_strided_slice %338 {offsets = [0, 0], sizes = [8, 64], strides = [1, 1]} : vector<8x96xf32> to vector<8x64xf32>
    %341 = arith.addf %339, %340 : vector<8x64xf32>
    %342 = arith.negf %341 : vector<8x64xf32>
    %343 = math.exp %342 : vector<8x64xf32>
    %cst_60 = arith.constant 1.000000e+00 : f32
    %344 = vector.broadcast %cst_60 : f32 to vector<8x64xf32>
    %345 = arith.addf %344, %343 : vector<8x64xf32>
    %346 = arith.divf %344, %345 : vector<8x64xf32>
    %347 = vector.extract_strided_slice %346 {offsets = [0, 0], sizes = [8, 32], strides = [1, 1]} : vector<8x64xf32> to vector<8x32xf32>
    %348 = vector.extract_strided_slice %346 {offsets = [0, 32], sizes = [8, 32], strides = [1, 1]} : vector<8x64xf32> to vector<8x32xf32>
    %349 = vector.extract_strided_slice %336 {offsets = [0, 64], sizes = [8, 32], strides = [1, 1]} : vector<8x96xf32> to vector<8x32xf32>
    %350 = vector.extract_strided_slice %338 {offsets = [0, 64], sizes = [8, 32], strides = [1, 1]} : vector<8x96xf32> to vector<8x32xf32>
    %351 = arith.addf %350, %214 : vector<8x32xf32>
    %352 = arith.mulf %347, %351 : vector<8x32xf32>
    %353 = arith.addf %349, %352 : vector<8x32xf32>
    %354 = math.tanh %353 : vector<8x32xf32>
    %cst_61 = arith.constant 1.000000e+00 : f32
    %355 = vector.broadcast %cst_61 : f32 to vector<8x32xf32>
    %356 = arith.subf %355, %348 : vector<8x32xf32>
    %357 = arith.mulf %356, %354 : vector<8x32xf32>
    %358 = arith.mulf %348, %335 : vector<8x32xf32>
    %359 = arith.addf %357, %358 : vector<8x32xf32>
    %360 = vector.extract_strided_slice %212 {offsets = [48, 0], sizes = [8, 96], strides = [1, 1]} : vector<64x96xf32> to vector<8x96xf32>
    %361 = arith.truncf %359 : vector<8x32xf32> to vector<8x32xbf16>
    %cst_62 = arith.constant dense<0.000000e+00> : vector<8x96xf32>
    %362 = tpu.matmul %361, %206, %cst_62 {dimension_numbers = #tpu.dot_dimension_numbers<[1], [0], [0], [1], [0, 0, 1, 1], [], []>} : vector<8x32xbf16>, vector<32x96xbf16>, vector<8x96xf32> -> vector<8x96xf32>
    %363 = vector.extract_strided_slice %360 {offsets = [0, 0], sizes = [8, 64], strides = [1, 1]} : vector<8x96xf32> to vector<8x64xf32>
    %364 = vector.extract_strided_slice %362 {offsets = [0, 0], sizes = [8, 64], strides = [1, 1]} : vector<8x96xf32> to vector<8x64xf32>
    %365 = arith.addf %363, %364 : vector<8x64xf32>
    %366 = arith.negf %365 : vector<8x64xf32>
    %367 = math.exp %366 : vector<8x64xf32>
    %cst_63 = arith.constant 1.000000e+00 : f32
    %368 = vector.broadcast %cst_63 : f32 to vector<8x64xf32>
    %369 = arith.addf %368, %367 : vector<8x64xf32>
    %370 = arith.divf %368, %369 : vector<8x64xf32>
    %371 = vector.extract_strided_slice %370 {offsets = [0, 0], sizes = [8, 32], strides = [1, 1]} : vector<8x64xf32> to vector<8x32xf32>
    %372 = vector.extract_strided_slice %370 {offsets = [0, 32], sizes = [8, 32], strides = [1, 1]} : vector<8x64xf32> to vector<8x32xf32>
    %373 = vector.extract_strided_slice %360 {offsets = [0, 64], sizes = [8, 32], strides = [1, 1]} : vector<8x96xf32> to vector<8x32xf32>
    %374 = vector.extract_strided_slice %362 {offsets = [0, 64], sizes = [8, 32], strides = [1, 1]} : vector<8x96xf32> to vector<8x32xf32>
    %375 = arith.addf %374, %214 : vector<8x32xf32>
    %376 = arith.mulf %371, %375 : vector<8x32xf32>
    %377 = arith.addf %373, %376 : vector<8x32xf32>
    %378 = math.tanh %377 : vector<8x32xf32>
    %cst_64 = arith.constant 1.000000e+00 : f32
    %379 = vector.broadcast %cst_64 : f32 to vector<8x32xf32>
    %380 = arith.subf %379, %372 : vector<8x32xf32>
    %381 = arith.mulf %380, %378 : vector<8x32xf32>
    %382 = arith.mulf %372, %359 : vector<8x32xf32>
    %383 = arith.addf %381, %382 : vector<8x32xf32>
    %384 = vector.extract_strided_slice %212 {offsets = [56, 0], sizes = [8, 96], strides = [1, 1]} : vector<64x96xf32> to vector<8x96xf32>
    %385 = arith.truncf %383 : vector<8x32xf32> to vector<8x32xbf16>
    %cst_65 = arith.constant dense<0.000000e+00> : vector<8x96xf32>
    %386 = tpu.matmul %385, %206, %cst_65 {dimension_numbers = #tpu.dot_dimension_numbers<[1], [0], [0], [1], [0, 0, 1, 1], [], []>} : vector<8x32xbf16>, vector<32x96xbf16>, vector<8x96xf32> -> vector<8x96xf32>
    %387 = vector.extract_strided_slice %384 {offsets = [0, 0], sizes = [8, 64], strides = [1, 1]} : vector<8x96xf32> to vector<8x64xf32>
    %388 = vector.extract_strided_slice %386 {offsets = [0, 0], sizes = [8, 64], strides = [1, 1]} : vector<8x96xf32> to vector<8x64xf32>
    %389 = arith.addf %387, %388 : vector<8x64xf32>
    %390 = arith.negf %389 : vector<8x64xf32>
    %391 = math.exp %390 : vector<8x64xf32>
    %cst_66 = arith.constant 1.000000e+00 : f32
    %392 = vector.broadcast %cst_66 : f32 to vector<8x64xf32>
    %393 = arith.addf %392, %391 : vector<8x64xf32>
    %394 = arith.divf %392, %393 : vector<8x64xf32>
    %395 = vector.extract_strided_slice %394 {offsets = [0, 0], sizes = [8, 32], strides = [1, 1]} : vector<8x64xf32> to vector<8x32xf32>
    %396 = vector.extract_strided_slice %394 {offsets = [0, 32], sizes = [8, 32], strides = [1, 1]} : vector<8x64xf32> to vector<8x32xf32>
    %397 = vector.extract_strided_slice %384 {offsets = [0, 64], sizes = [8, 32], strides = [1, 1]} : vector<8x96xf32> to vector<8x32xf32>
    %398 = vector.extract_strided_slice %386 {offsets = [0, 64], sizes = [8, 32], strides = [1, 1]} : vector<8x96xf32> to vector<8x32xf32>
    %399 = arith.addf %398, %214 : vector<8x32xf32>
    %400 = arith.mulf %395, %399 : vector<8x32xf32>
    %401 = arith.addf %397, %400 : vector<8x32xf32>
    %402 = math.tanh %401 : vector<8x32xf32>
    %cst_67 = arith.constant 1.000000e+00 : f32
    %403 = vector.broadcast %cst_67 : f32 to vector<8x32xf32>
    %404 = arith.subf %403, %396 : vector<8x32xf32>
    %405 = arith.mulf %404, %402 : vector<8x32xf32>
    %406 = arith.mulf %396, %383 : vector<8x32xf32>
    %407 = arith.addf %405, %406 : vector<8x32xf32>
    %cst_68 = arith.constant 0.000000e+00 : f32
    %408 = vector.broadcast %cst_68 : f32 to vector<8x32xf32>
    %c0_69 = arith.constant 0 : index
    %c0_70 = arith.constant 0 : index
    %c0_71 = arith.constant 0 : index
    %409 = vector.load %arg9[%c0_69, %c0_70, %c0_71] : memref<8x8x32xf32, #tpu.memory_space<vmem>>, vector<1x8x32xf32>
    %410 = vector.shape_cast %409 : vector<1x8x32xf32> to vector<8x32xf32>
    %411 = arith.mulf %239, %410 : vector<8x32xf32>
    %412 = arith.addf %408, %411 : vector<8x32xf32>
    %c1 = arith.constant 1 : index
    %c0_72 = arith.constant 0 : index
    %c0_73 = arith.constant 0 : index
    %413 = vector.load %arg9[%c1, %c0_72, %c0_73] : memref<8x8x32xf32, #tpu.memory_space<vmem>>, vector<1x8x32xf32>
    %414 = vector.shape_cast %413 : vector<1x8x32xf32> to vector<8x32xf32>
    %415 = arith.mulf %263, %414 : vector<8x32xf32>
    %416 = arith.addf %412, %415 : vector<8x32xf32>
    %c2 = arith.constant 2 : index
    %c0_74 = arith.constant 0 : index
    %c0_75 = arith.constant 0 : index
    %417 = vector.load %arg9[%c2, %c0_74, %c0_75] : memref<8x8x32xf32, #tpu.memory_space<vmem>>, vector<1x8x32xf32>
    %418 = vector.shape_cast %417 : vector<1x8x32xf32> to vector<8x32xf32>
    %419 = arith.mulf %287, %418 : vector<8x32xf32>
    %420 = arith.addf %416, %419 : vector<8x32xf32>
    %c3 = arith.constant 3 : index
    %c0_76 = arith.constant 0 : index
    %c0_77 = arith.constant 0 : index
    %421 = vector.load %arg9[%c3, %c0_76, %c0_77] : memref<8x8x32xf32, #tpu.memory_space<vmem>>, vector<1x8x32xf32>
    %422 = vector.shape_cast %421 : vector<1x8x32xf32> to vector<8x32xf32>
    %423 = arith.mulf %311, %422 : vector<8x32xf32>
    %424 = arith.addf %420, %423 : vector<8x32xf32>
    %c4 = arith.constant 4 : index
    %c0_78 = arith.constant 0 : index
    %c0_79 = arith.constant 0 : index
    %425 = vector.load %arg9[%c4, %c0_78, %c0_79] : memref<8x8x32xf32, #tpu.memory_space<vmem>>, vector<1x8x32xf32>
    %426 = vector.shape_cast %425 : vector<1x8x32xf32> to vector<8x32xf32>
    %427 = arith.mulf %335, %426 : vector<8x32xf32>
    %428 = arith.addf %424, %427 : vector<8x32xf32>
    %c5 = arith.constant 5 : index
    %c0_80 = arith.constant 0 : index
    %c0_81 = arith.constant 0 : index
    %429 = vector.load %arg9[%c5, %c0_80, %c0_81] : memref<8x8x32xf32, #tpu.memory_space<vmem>>, vector<1x8x32xf32>
    %430 = vector.shape_cast %429 : vector<1x8x32xf32> to vector<8x32xf32>
    %431 = arith.mulf %359, %430 : vector<8x32xf32>
    %432 = arith.addf %428, %431 : vector<8x32xf32>
    %c6 = arith.constant 6 : index
    %c0_82 = arith.constant 0 : index
    %c0_83 = arith.constant 0 : index
    %433 = vector.load %arg9[%c6, %c0_82, %c0_83] : memref<8x8x32xf32, #tpu.memory_space<vmem>>, vector<1x8x32xf32>
    %434 = vector.shape_cast %433 : vector<1x8x32xf32> to vector<8x32xf32>
    %435 = arith.mulf %383, %434 : vector<8x32xf32>
    %436 = arith.addf %432, %435 : vector<8x32xf32>
    %c7 = arith.constant 7 : index
    %c0_84 = arith.constant 0 : index
    %c0_85 = arith.constant 0 : index
    %437 = vector.load %arg9[%c7, %c0_84, %c0_85] : memref<8x8x32xf32, #tpu.memory_space<vmem>>, vector<1x8x32xf32>
    %438 = vector.shape_cast %437 : vector<1x8x32xf32> to vector<8x32xf32>
    %439 = arith.mulf %407, %438 : vector<8x32xf32>
    %440 = arith.addf %436, %439 : vector<8x32xf32>
    %cst_86 = arith.constant dense<0.000000e+00> : vector<8xf32>
    %441 = vector.multi_reduction <add>, %440, %cst_86 [1] : vector<8x32xf32> to vector<8xf32>
    %442 = vector.shape_cast %441 : vector<8xf32> to vector<8x1xf32>
    %c0_87 = arith.constant 0 : index
    %c0_88 = arith.constant 0 : index
    %443 = vector.load %arg10[%c0_87, %c0_88] : memref<1x1xf32, #tpu.memory_space<vmem>>, vector<1x1xf32>
    %444 = vector.broadcast %443 : vector<1x1xf32> to vector<8x1xf32>
    %445 = arith.addf %442, %444 : vector<8x1xf32>
    %c0_89 = arith.constant 0 : index
    %c0_90 = arith.constant 0 : index
    %446 = vector.load %arg11[%c0_89, %c0_90] : memref<8x1xf32, #tpu.memory_space<vmem>>, vector<8x1xf32>
    tpu.vector_store %arg11[%c0_89, %c0_90], %445 {strides = array<i32>} : memref<8x1xf32, #tpu.memory_space<vmem>>, vector<8x1xf32>,
    return
  }
}

</mosaic_0001>

<bundles_post_ra>
// kernel: tpu_custom_call.1
= control target key start
LH: loop header
LB: loop body
LE: loop exit
PB: predicated region body
PF: predicated region fallthrough
CT: control target
= control target key end

     0   :  { %s2514_s0 = inlined_call_operand.vmem [shape: f32[64,4], index: 0, kind: input, shape index: {}]   ;;  %s2515_s1 = inlined_call_operand.vmem [shape: bf16[4,96], index: 1, kind: input, shape index: {}]   ;;  %s2516_s2 = inlined_call_operand.vmem [shape: bf16[32,96], index: 2, kind: input, shape index: {}]   ;;  %s2517_s3 = inlined_call_operand.vmem [shape: f32[1,96], index: 3, kind: input, shape index: {}]   ;;  %s2518_s4 = inlined_call_operand.vmem [shape: f32[1,32], index: 4, kind: input, shape index: {}]   ;;  %s2519_s5 = inlined_call_operand.vmem [shape: bf16[32,96], index: 5, kind: input, shape index: {}]   ;;  %s2520_s6 = inlined_call_operand.hbm [shape: bf16[32,96], index: 6, kind: input, shape index: {}]   ;;  %s2521_s7 = inlined_call_operand.vmem [shape: f32[1,96], index: 7, kind: input, shape index: {}]   ;;  %s2522_s8 = inlined_call_operand.vmem [shape: f32[1,32], index: 8, kind: input, shape index: {}]   ;;  %s2523_s9 = inlined_call_operand.vmem [shape: f32[8,8,32], index: 9, kind: input, shape index: {}]   ;;  %s2524_s10 = inlined_call_operand.<no memory space> [shape: f32[1,1], index: 10, kind: input, shape index: {}]   ;;  %s2525_s11 = inlined_call_operand.vmem [shape: f32[8,1], index: 11, kind: output, shape index: {}]  }
   0x1   :  { %v16_v0 = vstv %s2524_s10 }
   0x2   :  { %17 = vst [vmem:[#allocation2] sm:$0x1] %v16_v0 }
   0x3   :  { %18 = vsyncpa [#allocation4], 0  ;;  %s1982_s19 = smov [#allocation3]   ;;  %s1958_s23 = scalar_lea.hbm %s2520_s6, 256 }
   0x4   :  { %s36_s20 = sshll.u32 %s1982_s19, 4  ;;  %p1959_p0 = scmp.ne.s32.totalorder %s2520_s6, %s1958_s23  ;;  %s37_s20 = int_to_ptr.vmem [resolvable:$true] %s36_s20 }
   0x5   :  { %p1962_p1 = scmp.lt.u32.totalorder %s1958_s23, %s2520_s6 }
   0x7   :  { %p1964_p2 = pnand %p1962_p1, %p1959_p0 }
   0x9   :  { %1967 = shalt.err (!%p1964_p2)
}
   0xa   :  { %s1968_s10 = scalar_lea.vmem %s37_s20, 256  ;;  %p1973_p4 = scmp.lt.s32.totalorder %s37_s20, %s37_s20 }
   0xb   :  { %p1969_p3 = scmp.ne.s32.totalorder %s37_s20, %s1968_s10  ;;  %p1974_p5 = scmp.lt.s32.totalorder %s1968_s10, %s1968_s10 }
   0xd   :  { %p1975_p6 = por %p1974_p5, %p1973_p4 }
   0xf   :  { %p1976_p7 = pnand %p1975_p6, %p1969_p3 }
  0x11   :  { %1979 = shalt.err (!%p1976_p7)
}
  0x12   :  { %s1983_s28 = smov 64   ;;  %s1984_s29 = smov 4  }
  0x13   :  { %42 = dma.hbm_to_vmem [thread:$0]  %s2520_s6, 256, %s37_s20, [#allocation4], %s1983_s28, %s1983_s28, %s1984_s29  }
  0x14   :  { %1980 = dma.done.wait [#allocation4], 256  }
  0x15   :  { %1981 = vsyncadd [#allocation4], 4294967040  ;;  %v1985_v1 = vmov 0.0   ;;  %vm1986_vm0 = vmmov 0   ;;  %vm93_vm1 = vcmask 1041408   ;;  %v2076_v3 = vld [vmem:[%s2516_s2] sm:$0xff]  }
  0x16   :  { %1707 = vmatprep.subr.bf16.mxu1 %v1985_v1  ;;  %1711 = vmatprep.mubr.msk.bf16.mxu1 %vm1986_vm0, %v1985_v1  ;;  %v63_v2 = vld [vmem:[%s2515_s1] sm:$0x3]  ;;  %v56_v6 = vld [vmem:[%s2514_s0 + $0x8] sm:$0xff]  ;;  %vm80_vm2 = vcmask 31744   ;;  %v57_v8 = vld [vmem:[%s2514_s0 + $0x10] sm:$0xff]  ;;  %v1987_v13 = vmov 0  }
  0x17   :  { %1847 = vmatprep.subr.msk.bf16.mxu0 %vm93_vm1, %v63_v2  ;;  %v95_v4 = vsel %vm93_vm1, %v63_v2, 0  ;;  %v55_v5 = vld [vmem:[%s2514_s0] sm:$0xff]  ;;  %v58_v9 = vld [vmem:[%s2514_s0 + $0x18] sm:$0xff]  ;;  %1708 = vmatpush3.bf16.msra.mxu1 %v2076_v3  ;;  %v2094_v11 = vld [vmem:[%s2516_s2 + $0x8] sm:$0xff]   ;;  %s1988_s27 = smov 96   ;;  %vm179_vm3 = vcmask 261120  }
  0x18   :  { %1698 = vmatpush3.bf16.msra.mxu0 %v95_v4  ;;  %v70_v7 = vpack.c.bf16 %v56_v6, %v55_v5  ;;  %v71_v10 = vpack.c.bf16 %v58_v9, %v57_v8  ;;  %v1587_v12 = vld [vmem:[%s2518_s4] ss:$0 sm:$0xff]  ;;  %1709 = vmatprep.subr.bf16.mxu1 %v1985_v1  ;;  %v60_v59 = vld [vmem:[%s2514_s0 + $0x28] sm:$0xff]  ;;  %v61_v60 = vld [vmem:[%s2514_s0 + $0x30] sm:$0xff]  ;;  %s1989_s1 = smov 32   ;;  %vm1575_vm4 = vcmask 7168  }
  0x19   :  { %1723 = vmatprep.subr.bf16.mxu0 %v1985_v1  ;;  %230 = vrot.lane.b32.xlu0 %v1587_v12, %s1983_s28  ;;  %v2128_v24 = vld [vmem:[%s2517_s3] ss:$0 sm:$0xff]  ;;  %v62_v62 = vld [vmem:[%s2514_s0 + $0x38] sm:$0xff] }
  0x1a   :  { %1699 = vmatprep.mubr.msk.bf16.mxu0 %vm80_vm2, %v70_v7  ;;  %v59_v58 = vld [vmem:[%s2514_s0 + $0x20] sm:$0xff]  ;;  %v73_v63 = vpack.c.bf16 %v62_v62, %v61_v60 }
  0x1b   :  { %1700 = vmatmul.mubr.msk.bf16.vlgmr.msra.gmra.mrb[0].mxu0 %vm80_vm2, %v71_v10  ;;  %1710 = vmatpush3.bf16.msra.mxu1 %v2094_v11  ;;  %v72_v61 = vpack.c.bf16 %v60_v59, %v59_v58 }
  0x1c   :  { %1724 = vmatpush3.bf16.msra.mxu0 %v2076_v3  ;;  %1715 = vmatprep.subr.bf16.mxu1 %v1985_v1 }
  0x1d   :  { %1725 = vmatprep.subr.bf16.mxu0 %v1985_v1  ;;  %1703 = vmatprep.mubr.msk.bf16.mxu0 %vm80_vm2, %v72_v61 }
  0x1e   :  { %1712 = vmatmul.mubr.bf16.vlgmr.msra.gmra.mrb[0].mxu1 %v1987_v13 }
  0x1f   :  { %1716 = vmatpush3.bf16.msra.mxu1 %v2076_v3  ;;  %1719 = vmatprep.mubr.msk.bf16.mxu1 %vm1986_vm0, %v1985_v1 }
  0x20   :  { %1726 = vmatpush3.bf16.msra.mxu0 %v2094_v11  ;;  %1717 = vmatprep.subr.bf16.mxu1 %v1985_v1 }
  0x21   :  { %1739 = vmatprep.subr.bf16.mxu0 %v1985_v1 }
  0x23   :  { %1718 = vmatpush3.bf16.msra.mxu1 %v2094_v11  ;;  %1704 = vmatmul.mubr.msk.bf16.gmra.mrb[4].mxu0 %vm80_vm2, %v73_v63 }
  0x24   :  { %1731 = vmatprep.subr.bf16.mxu1 %v1985_v1  ;;  %1727 = vmatprep.mubr.msk.bf16.mxu0 %vm1986_vm0, %v1985_v1 }
  0x8b   :  { %v2121_v17 = vpop.permute.xlu0 %230 }
  0xee   :  { %v2117_v14 = vpop.f32.mrb[0].mxu0 }
  0xef   :  { %v131_v15 = vpop.f32.mrb[1].mxu0 }
  0xf0   :  { %v2119_v16 = vpop.f32.mrb[2].mxu0  ;;  %v132_v25 = vadd.f32 %v2128_v24, %v131_v15 }
  0xf1   :  { %v134_v18 = vpop.f32.mrb[3].mxu0  ;;  %v217_v19 = vpop.f32.mrb[0].mxu1 }
  0xf2   :  { %v1713_v20 = vpop.f32.mrb[1].mxu1  ;;  %v233_v21 = vadd.f32 %v2121_v17, %v217_v19  ;;  %v223_v26 = vadd.f32 %v217_v19, %v132_v25  ;;  %v135_v48 = vadd.f32 %v2128_v24, %v134_v18 }
  0xf3   :  { %v220_v22 = vpop.f32.mrb[2].mxu1 }
  0xf4   :  { %235 = vrot.lane.b32.xlu0 %v233_v21, %s1983_s28  ;;  %v1714_v23 = vpop.f32.mrb[3].mxu1  ;;  %v1590_v27 = vmul.f32 -1.442695, %v223_v26 }
  0xf6   :  { %1862 = vpow2.f32 %v1590_v27  ;;  %v2172_v9 = vpop.f32.mrb[4].mxu0 }
  0xf7   :  { %v2174_v10 = vpop.f32.mrb[5].mxu0 }
  0xf8   :  { %v2176_v12 = vpop.f32.mrb[6].mxu0 }
  0xf9   :  { %v2178_v15 = vpop.f32.mrb[7].mxu0 }
 0x100   :  { %v1863_v28 = vpop.eup %1862 }
 0x101   :  { %v227_v29 = vadd.f32 1.0, %v1863_v28 }
 0x103   :  { %1864 = vrcp.f32 %v227_v29 }
 0x10d   :  { %v1865_v30 = vpop.eup %1864 }
 0x10e   :  { %v245_v36 = vsub.f32 1.0, %v1865_v30  ;;  %v251_v38 = vmul.f32 0.0, %v1865_v30 }
 0x166   :  { %v236_v31 = vpop.permute.xlu0 %235 }
 0x167   :  { %v238_v32 = vmul.f32 %v1865_v30, %v236_v31 }
 0x169   :  { %240 = vrot.lane.b32.xlu1 %v238_v32, %s1983_s28 }
 0x1db   :  { %v241_v33 = vpop.permute.xlu1 %240 }
 0x1dc   :  { %v243_v34 = vadd.f32 %v241_v33, %v132_v25  ;;  %v140_v25 = vadd.f32 %v2117_v14, %v2128_v24 }
 0x1de   :  { %1866 = vtanh.f32 %v243_v34 }
 0x1e8   :  { %v1867_v35 = vpop.eup %1866 }
 0x1e9   :  { %247 = vrot.lane.b32.xlu1 %v1867_v35, %s1988_s27 }
 0x25b   :  { %v248_v37 = vpop.permute.xlu1 %247 }
 0x25c   :  { %v250_v39 = vmul.f32 %v248_v37, %v245_v36 }
 0x25e   :  { %v2133_v40 = vadd.f32 %v251_v38, %v250_v39 }
 0x260   :  { %v253_v41 = vpack.c.bf16 %v2133_v40, %v2133_v40 }
 0x262   :  { %255 = vrot.lane.b32.xlu0 %v253_v41, %s1988_s27 }
 0x2d4   :  { %v256_v42 = vpop.permute.xlu0 %255 }
 0x2d5   :  { %1720 = vmatmul.mubr.msk.bf16.vlgmr.msra.gmra.mrb[4].mxu1 %vm179_vm3, %v256_v42 }
 0x2d6   :  { %1732 = vmatpush3.bf16.msra.mxu1 %v2076_v3  ;;  %1735 = vmatprep.mubr.msk.bf16.mxu1 %vm1986_vm0, %v1985_v1 }
 0x2d7   :  { %1733 = vmatprep.subr.bf16.mxu1 %v1985_v1 }
 0x2da   :  { %1734 = vmatpush3.bf16.msra.mxu1 %v2094_v11 }
 0x2db   :  { %1747 = vmatprep.subr.bf16.mxu1 %v1985_v1 }
 0x3a8   :  { %v294_v43 = vpop.f32.mrb[4].mxu1 }
 0x3a9   :  { %v1721_v44 = vpop.f32.mrb[5].mxu1  ;;  %v307_v45 = vadd.f32 %v294_v43, %v2121_v17  ;;  %v300_v49 = vadd.f32 %v294_v43, %v135_v48 }
 0x3aa   :  { %v297_v46 = vpop.f32.mrb[6].mxu1 }
 0x3ab   :  { %309 = vrot.lane.b32.xlu1 %v307_v45, %s1983_s28  ;;  %v1722_v47 = vpop.f32.mrb[7].mxu1  ;;  %v1592_v50 = vmul.f32 -1.442695, %v300_v49 }
 0x3ad   :  { %1868 = vpow2.f32 %v1592_v50 }
 0x3b7   :  { %v1869_v51 = vpop.eup %1868 }
 0x3b8   :  { %v304_v52 = vadd.f32 1.0, %v1869_v51 }
 0x3ba   :  { %1870 = vrcp.f32 %v304_v52 }
 0x3c4   :  { %v1871_v53 = vpop.eup %1870 }
 0x3c5   :  { %v319_v2 = vsub.f32 1.0, %v1871_v53  ;;  %v325_v5 = vmul.f32 %v1871_v53, %v2133_v40 }
 0x41d   :  { %v310_v54 = vpop.permute.xlu1 %309 }
 0x41e   :  { %v312_v55 = vmul.f32 %v1871_v53, %v310_v54 }
 0x420   :  { %314 = vrot.lane.b32.xlu0 %v312_v55, %s1983_s28 }
 0x492   :  { %v315_v56 = vpop.permute.xlu0 %314 }
 0x493   :  { %v317_v57 = vadd.f32 %v315_v56, %v135_v48  ;;  %v143_v48 = vadd.f32 %v2119_v16, %v2128_v24 }
 0x495   :  { %1872 = vtanh.f32 %v317_v57 }
 0x49f   :  { %v1873_v0 = vpop.eup %1872 }
 0x4a0   :  { %321 = vrot.lane.b32.xlu1 %v1873_v0, %s1988_s27 }
 0x512   :  { %v322_v4 = vpop.permute.xlu1 %321 }
 0x513   :  { %v324_v6 = vmul.f32 %v322_v4, %v319_v2 }
 0x515   :  { %v2167_v7 = vadd.f32 %v325_v5, %v324_v6 }
 0x517   :  { %v327_v8 = vpack.c.bf16 %v2167_v7, %v2167_v7 }
 0x519   :  { %329 = vrot.lane.b32.xlu0 %v327_v8, %s1988_s27 }
 0x58b   :  { %v330_v18 = vpop.permute.xlu0 %329 }
 0x58c   :  { %1728 = vmatmul.mubr.msk.bf16.vlgmr.msra.gmra.mrb[8].mxu0 %vm179_vm3, %v330_v18  ;;  %v148_v18 = vadd.f32 %v2128_v24, %v2174_v10 }
 0x58d   :  { %1740 = vmatpush3.bf16.msra.mxu0 %v2076_v3  ;;  %1743 = vmatprep.mubr.msk.bf16.mxu0 %vm1986_vm0, %v1985_v1 }
 0x58e   :  { %1741 = vmatprep.subr.bf16.mxu0 %v1985_v1 }
 0x591   :  { %1742 = vmatpush3.bf16.msra.mxu0 %v2094_v11 }
 0x592   :  { %1755 = vmatprep.subr.bf16.mxu0 %v1985_v1 }
 0x65f   :  { %v368_v19 = vpop.f32.mrb[8].mxu0 }
 0x660   :  { %v1729_v20 = vpop.f32.mrb[9].mxu0  ;;  %v381_v21 = vadd.f32 %v368_v19, %v2121_v17  ;;  %v374_v26 = vadd.f32 %v368_v19, %v140_v25 }
 0x661   :  { %v371_v22 = vpop.f32.mrb[10].mxu0 }
 0x662   :  { %383 = vrot.lane.b32.xlu1 %v381_v21, %s1983_s28  ;;  %v1730_v23 = vpop.f32.mrb[11].mxu0  ;;  %v1594_v27 = vmul.f32 -1.442695, %v374_v26 }
 0x664   :  { %1874 = vpow2.f32 %v1594_v27 }
 0x66e   :  { %v1875_v28 = vpop.eup %1874 }
 0x66f   :  { %v378_v29 = vadd.f32 1.0, %v1875_v28 }
 0x671   :  { %1876 = vrcp.f32 %v378_v29 }
 0x67b   :  { %v1877_v30 = vpop.eup %1876 }
 0x67c   :  { %v393_v36 = vsub.f32 1.0, %v1877_v30  ;;  %v399_v14 = vmul.f32 %v1877_v30, %v2167_v7 }
 0x6d4   :  { %v384_v31 = vpop.permute.xlu1 %383 }
 0x6d5   :  { %v386_v32 = vmul.f32 %v1877_v30, %v384_v31 }
 0x6d7   :  { %388 = vrot.lane.b32.xlu0 %v386_v32, %s1983_s28 }
 0x749   :  { %v389_v33 = vpop.permute.xlu0 %388 }
 0x74a   :  { %v391_v34 = vadd.f32 %v389_v33, %v140_v25 }
 0x74c   :  { %1878 = vtanh.f32 %v391_v34 }
 0x756   :  { %v1879_v35 = vpop.eup %1878 }
 0x757   :  { %395 = vrot.lane.b32.xlu1 %v1879_v35, %s1988_s27 }
 0x7c9   :  { %v396_v37 = vpop.permute.xlu1 %395 }
 0x7ca   :  { %v398_v38 = vmul.f32 %v396_v37, %v393_v36 }
 0x7cc   :  { %v2194_v39 = vadd.f32 %v399_v14, %v398_v38 }
 0x7ce   :  { %v401_v41 = vpack.c.bf16 %v2194_v39, %v2194_v39 }
 0x7d0   :  { %403 = vrot.lane.b32.xlu0 %v401_v41, %s1988_s27 }
 0x842   :  { %v404_v42 = vpop.permute.xlu0 %403 }
 0x843   :  { %1736 = vmatmul.mubr.msk.bf16.vlgmr.msra.gmra.mrb[8].mxu1 %vm179_vm3, %v404_v42 }
 0x844   :  { %1748 = vmatpush3.bf16.msra.mxu1 %v2076_v3  ;;  %1751 = vmatprep.mubr.msk.bf16.mxu1 %vm1986_vm0, %v1985_v1 }
 0x845   :  { %1749 = vmatprep.subr.bf16.mxu1 %v1985_v1 }
 0x848   :  { %1750 = vmatpush3.bf16.msra.mxu1 %v2094_v11 }
 0x849   :  { %1763 = vmatprep.subr.bf16.mxu1 %v1985_v1 }
 0x916   :  { %v442_v43 = vpop.f32.mrb[8].mxu1 }
 0x917   :  { %v1737_v44 = vpop.f32.mrb[9].mxu1  ;;  %v455_v45 = vadd.f32 %v442_v43, %v2121_v17  ;;  %v448_v49 = vadd.f32 %v442_v43, %v143_v48 }
 0x918   :  { %v445_v46 = vpop.f32.mrb[10].mxu1 }
 0x919   :  { %457 = vrot.lane.b32.xlu1 %v455_v45, %s1983_s28  ;;  %v1738_v47 = vpop.f32.mrb[11].mxu1  ;;  %v1596_v50 = vmul.f32 -1.442695, %v448_v49 }
 0x91b   :  { %1880 = vpow2.f32 %v1596_v50 }
 0x925   :  { %v1881_v51 = vpop.eup %1880 }
 0x926   :  { %v452_v52 = vadd.f32 1.0, %v1881_v51 }
 0x928   :  { %1882 = vrcp.f32 %v452_v52 }
 0x932   :  { %v1883_v53 = vpop.eup %1882 }
 0x933   :  { %v467_v59 = vsub.f32 1.0, %v1883_v53  ;;  %v473_v16 = vmul.f32 %v1883_v53, %v2194_v39 }
 0x98b   :  { %v458_v54 = vpop.permute.xlu1 %457 }
 0x98c   :  { %v460_v55 = vmul.f32 %v1883_v53, %v458_v54 }
 0x98e   :  { %462 = vrot.lane.b32.xlu0 %v460_v55, %s1983_s28 }
 0xa00   :  { %v463_v56 = vpop.permute.xlu0 %462 }
 0xa01   :  { %v465_v57 = vadd.f32 %v463_v56, %v143_v48 }
 0xa03   :  { %1884 = vtanh.f32 %v465_v57 }
 0xa0d   :  { %v1885_v58 = vpop.eup %1884 }
 0xa0e   :  { %469 = vrot.lane.b32.xlu1 %v1885_v58, %s1988_s27 }
 0xa80   :  { %v470_v60 = vpop.permute.xlu1 %469 }
 0xa81   :  { %v472_v61 = vmul.f32 %v470_v60, %v467_v59 }
 0xa83   :  { %v2213_v62 = vadd.f32 %v473_v16, %v472_v61  ;;  %v156_v61 = vadd.f32 %v2172_v9, %v2128_v24  ;;  %v781_v9 = vpack.c.bf16 %v2167_v7, %v2133_v40 }
 0xa85   :  { %v475_v63 = vpack.c.bf16 %v2213_v62, %v2213_v62 }
 0xa87   :  { %477 = vrot.lane.b32.xlu0 %v475_v63, %s1988_s27 }
 0xaf9   :  { %v478_v0 = vpop.permute.xlu0 %477 }
 0xafa   :  { %1744 = vmatmul.mubr.msk.bf16.vlgmr.msra.gmra.mrb[12].mxu0 %vm179_vm3, %v478_v0 }
 0xafb   :  { %1756 = vmatpush3.bf16.msra.mxu0 %v2076_v3  ;;  %1759 = vmatprep.mubr.msk.bf16.mxu0 %vm1986_vm0, %v1985_v1 }
 0xafc   :  { %1757 = vmatprep.subr.bf16.mxu0 %v1985_v1 }
 0xaff   :  { %1758 = vmatpush3.bf16.msra.mxu0 %v2094_v11 }
 0xbcd   :  { %v516_v2 = vpop.f32.mrb[12].mxu0 }
 0xbce   :  { %v1745_v4 = vpop.f32.mrb[13].mxu0  ;;  %v529_v5 = vadd.f32 %v516_v2, %v2121_v17  ;;  %v522_v19 = vadd.f32 %v516_v2, %v148_v18 }
 0xbcf   :  { %v519_v6 = vpop.f32.mrb[14].mxu0 }
 0xbd0   :  { %531 = vrot.lane.b32.xlu1 %v529_v5, %s1983_s28  ;;  %v1746_v8 = vpop.f32.mrb[15].mxu0  ;;  %v1598_v20 = vmul.f32 -1.442695, %v522_v19 }
 0xbd2   :  { %1886 = vpow2.f32 %v1598_v20  ;;  %v1858_v20 = vld [vmem:[%s2519_s5] sm:$0xff]  }
 0xbd3   :  { %1771 = vmatprep.subr.bf16.mxu0 %v1858_v20 }
 0xbdc   :  { %v1887_v21 = vpop.eup %1886 }
 0xbdd   :  { %v526_v22 = vadd.f32 1.0, %v1887_v21 }
 0xbdf   :  { %1888 = vrcp.f32 %v526_v22  ;;  %v1859_v22 = vld [vmem:[%s2519_s5 + $0x8] sm:$0xff]  }
 0xbe9   :  { %v1889_v23 = vpop.eup %1888 }
 0xbea   :  { %v541_v30 = vsub.f32 1.0, %v1889_v23  ;;  %v547_v10 = vmul.f32 %v1889_v23, %v2213_v62 }
 0xc42   :  { %v532_v25 = vpop.permute.xlu1 %531 }
 0xc43   :  { %v534_v26 = vmul.f32 %v1889_v23, %v532_v25 }
 0xc45   :  { %536 = vrot.lane.b32.xlu0 %v534_v26, %s1983_s28 }
 0xcb7   :  { %v537_v27 = vpop.permute.xlu0 %536 }
 0xcb8   :  { %v539_v28 = vadd.f32 %v537_v27, %v148_v18 }
 0xcba   :  { %1890 = vtanh.f32 %v539_v28  ;;  %v1612_v28 = vld [vmem:[%s2522_s8] ss:$0 sm:$0xff] }
 0xcc4   :  { %v1891_v29 = vpop.eup %1890 }
 0xcc5   :  { %543 = vrot.lane.b32.xlu1 %v1891_v29, %s1988_s27 }
 0xd37   :  { %v544_v31 = vpop.permute.xlu1 %543 }
 0xd38   :  { %v546_v32 = vmul.f32 %v544_v31, %v541_v30  ;;  %v782_v30 = vpack.c.bf16 %v2213_v62, %v2194_v39  ;;  %v2286_v31 = vld [vmem:[#allocation3] sm:$0xff]  }
 0xd3a   :  { %v2231_v33 = vadd.f32 %v547_v10, %v546_v32  ;;  %v2290_v32 = vld [vmem:[#allocation3 + $0x8] sm:$0xff]  }
 0xd3c   :  { %v549_v34 = vpack.c.bf16 %v2231_v33, %v2231_v33 }
 0xd3e   :  { %551 = vrot.lane.b32.xlu0 %v549_v34, %s1988_s27 }
 0xdb0   :  { %v552_v35 = vpop.permute.xlu0 %551 }
 0xdb1   :  { %1752 = vmatmul.mubr.msk.bf16.vlgmr.msra.gmra.mrb[12].mxu1 %vm179_vm3, %v552_v35 }
 0xdb2   :  { %1764 = vmatpush3.bf16.msra.mxu1 %v2076_v3  ;;  %1767 = vmatprep.mubr.msk.bf16.mxu1 %vm1986_vm0, %v1985_v1  ;;  %v151_v3 = vadd.f32 %v2128_v24, %v2178_v15 }
 0xdb3   :  { %1765 = vmatprep.subr.bf16.mxu1 %v1985_v1 }
 0xdb6   :  { %1766 = vmatpush3.bf16.msra.mxu1 %v2094_v11 }
 0xdb7   :  { %1783 = vmatprep.subr.bf16.mxu1 %v1985_v1 }
 0xe84   :  { %v590_v36 = vpop.f32.mrb[12].mxu1 }
 0xe85   :  { %v1753_v37 = vpop.f32.mrb[13].mxu1  ;;  %v603_v14 = vadd.f32 %v590_v36, %v2121_v17  ;;  %v596_v42 = vadd.f32 %v590_v36, %v151_v3 }
 0xe86   :  { %v593_v38 = vpop.f32.mrb[14].mxu1 }
 0xe87   :  { %605 = vrot.lane.b32.xlu1 %v603_v14, %s1983_s28  ;;  %v1754_v41 = vpop.f32.mrb[15].mxu1  ;;  %v1600_v43 = vmul.f32 -1.442695, %v596_v42 }
 0xe89   :  { %1892 = vpow2.f32 %v1600_v43 }
 0xe93   :  { %v1893_v44 = vpop.eup %1892 }
 0xe94   :  { %v600_v45 = vadd.f32 1.0, %v1893_v44 }
 0xe96   :  { %1894 = vrcp.f32 %v600_v45 }
 0xea0   :  { %v1895_v11 = vpop.eup %1894 }
 0xea1   :  { %v615_v51 = vsub.f32 1.0, %v1895_v11  ;;  %v621_v15 = vmul.f32 %v1895_v11, %v2231_v33 }
 0xef9   :  { %v606_v46 = vpop.permute.xlu1 %605 }
 0xefa   :  { %v608_v47 = vmul.f32 %v1895_v11, %v606_v46  ;;  %v2322_v11 = vld [vmem:[%s2521_s7] ss:$0 sm:$0xff] }
 0xefc   :  { %610 = vrot.lane.b32.xlu0 %v608_v47, %s1983_s28 }
 0xf6e   :  { %v611_v48 = vpop.permute.xlu0 %610 }
 0xf6f   :  { %v613_v49 = vadd.f32 %v611_v48, %v151_v3 }
 0xf71   :  { %1896 = vtanh.f32 %v613_v49 }
 0xf7b   :  { %v1897_v50 = vpop.eup %1896 }
 0xf7c   :  { %617 = vrot.lane.b32.xlu1 %v1897_v50, %s1988_s27 }
 0xfee   :  { %v618_v52 = vpop.permute.xlu1 %617 }
 0xfef   :  { %v620_v53 = vmul.f32 %v618_v52, %v615_v51 }
 0xff1   :  { %v2250_v54 = vadd.f32 %v621_v15, %v620_v53 }
 0xff3   :  { %v623_v55 = vpack.c.bf16 %v2250_v54, %v2250_v54 }
 0xff5   :  { %625 = vrot.lane.b32.xlu0 %v623_v55, %s1988_s27 }
0x1067   :  { %v626_v56 = vpop.permute.xlu0 %625 }
0x1068   :  { %1760 = vmatmul.mubr.msk.bf16.vlgmr.msra.gmra.mrb[16].mxu0 %vm179_vm3, %v626_v56 }
0x1069   :  { %1772 = vmatpush3.bf16.msra.mxu0 %v1858_v20 }
0x106a   :  { %1773 = vmatprep.subr.bf16.mxu0 %v1859_v22 }
0x106d   :  { %1774 = vmatpush3.bf16.msra.mxu0 %v1859_v22 }
0x106e   :  { %1799 = vmatprep.subr.bf16.mxu0 %v1985_v1 }
0x113b   :  { %v664_v57 = vpop.f32.mrb[16].mxu0 }
0x113c   :  { %v1761_v58 = vpop.f32.mrb[17].mxu0  ;;  %v677_v59 = vadd.f32 %v664_v57, %v2121_v17  ;;  %v670_v63 = vadd.f32 %v664_v57, %v156_v61 }
0x113d   :  { %v667_v60 = vpop.f32.mrb[18].mxu0  ;;  %v159_v58 = vadd.f32 %v2176_v12, %v2128_v24 }
0x113e   :  { %679 = vrot.lane.b32.xlu1 %v677_v59, %s1983_s28  ;;  %v1762_v16 = vpop.f32.mrb[19].mxu0  ;;  %v1602_v0 = vmul.f32 -1.442695, %v670_v63 }
0x1140   :  { %1898 = vpow2.f32 %v1602_v0 }
0x114a   :  { %v1899_v2 = vpop.eup %1898 }
0x114b   :  { %v674_v4 = vadd.f32 1.0, %v1899_v2 }
0x114d   :  { %1900 = vrcp.f32 %v674_v4 }
0x1157   :  { %v1901_v5 = vpop.eup %1900 }
0x1158   :  { %v689_v23 = vsub.f32 1.0, %v1901_v5  ;;  %v695_v26 = vmul.f32 %v1901_v5, %v2250_v54 }
0x11b0   :  { %v680_v6 = vpop.permute.xlu1 %679 }
0x11b1   :  { %v682_v8 = vmul.f32 %v1901_v5, %v680_v6 }
0x11b3   :  { %684 = vrot.lane.b32.xlu0 %v682_v8, %s1983_s28 }
0x1225   :  { %v685_v18 = vpop.permute.xlu0 %684 }
0x1226   :  { %v687_v19 = vadd.f32 %v685_v18, %v156_v61 }
0x1228   :  { %1902 = vtanh.f32 %v687_v19 }
0x1232   :  { %v1903_v21 = vpop.eup %1902 }
0x1233   :  { %691 = vrot.lane.b32.xlu1 %v1903_v21, %s1988_s27  ;;  %v783_v21 = vpack.c.bf16 %v2250_v54, %v2231_v33 }
0x1237   :  { %795 = vrot.lane.b32.xlu1 %v781_v9, %s1988_s27 }
0x123b   :  { %956 = vrot.lane.b32.xlu1 %v1612_v28, %s1983_s28 }
0x12a5   :  { %v692_v25 = vpop.permute.xlu1 %691 }
0x12a6   :  { %v694_v27 = vmul.f32 %v692_v25, %v689_v23 }
0x12a8   :  { %v2276_v40 = vadd.f32 %v695_v26, %v694_v27 }
0x12a9   :  { %v796_v7 = vpop.permute.xlu1 %795 }
0x12aa   :  { %1775 = vmatprep.mubr.msk.bf16.mxu0 %vm179_vm3, %v796_v7  ;;  %v697_v29 = vpack.c.bf16 %v2276_v40, %v2276_v40 }
0x12ac   :  { %699 = vrot.lane.b32.xlu0 %v697_v29, %s1988_s27 }
0x12ad   :  { %v2313_v38 = vpop.permute.xlu1 %956 }
0x12b0   :  { %797 = vrot.lane.b32.xlu0 %v782_v30, %s1988_s27 }
0x131e   :  { %v700_v10 = vpop.permute.xlu0 %699 }
0x131f   :  { %1768 = vmatmul.mubr.msk.bf16.vlgmr.msra.gmra.mrb[16].mxu1 %vm179_vm3, %v700_v10 }
0x1320   :  { %1784 = vmatpush3.bf16.msra.mxu1 %v2286_v31  ;;  %1787 = vmatprep.mubr.msk.bf16.mxu1 %vm1986_vm0, %v1985_v1 }
0x1321   :  { %1785 = vmatprep.subr.bf16.mxu1 %v1985_v1 }
0x1322   :  { %v798_v34 = vpop.permute.xlu0 %797 }
0x1323   :  { %1776 = vmatmul.mubr.msk.bf16.vlgmr.msra.gmra.mrb[20].mxu0 %vm179_vm3, %v798_v34 }
0x1324   :  { %1786 = vmatpush3.bf16.msra.mxu1 %v2290_v32  ;;  %1800 = vmatpush3.bf16.msra.mxu0 %v2286_v31 }
0x1325   :  { %1791 = vmatprep.subr.bf16.mxu1 %v1985_v1  ;;  %1801 = vmatprep.subr.bf16.mxu0 %v1985_v1 }
0x1327   :  { %1788 = vmatmul.mubr.bf16.vlgmr.msra.gmra.mrb[20].mxu1 %v1987_v13 }
0x1328   :  { %1792 = vmatpush3.bf16.msra.mxu1 %v2286_v31  ;;  %1795 = vmatprep.mubr.msk.bf16.mxu1 %vm1986_vm0, %v1985_v1 }
0x1329   :  { %1793 = vmatprep.subr.bf16.mxu1 %v1985_v1  ;;  %1802 = vmatpush3.bf16.msra.mxu0 %v2290_v32 }
0x132a   :  { %1815 = vmatprep.subr.bf16.mxu0 %v1985_v1 }
0x132c   :  { %1794 = vmatpush3.bf16.msra.mxu1 %v2290_v32 }
0x132d   :  { %1807 = vmatprep.subr.bf16.mxu1 %v1985_v1 }
0x13f2   :  { %v738_v39 = vpop.f32.mrb[16].mxu1 }
0x13f3   :  { %v1769_v62 = vpop.f32.mrb[17].mxu1  ;;  %v751_v57 = vadd.f32 %v738_v39, %v2121_v17  ;;  %v744_v59 = vadd.f32 %v738_v39, %v159_v58 }
0x13f4   :  { %v741_v35 = vpop.f32.mrb[18].mxu1 }
0x13f5   :  { %v1770_v36 = vpop.f32.mrb[19].mxu1  ;;  %v1604_v60 = vmul.f32 -1.442695, %v744_v59 }
0x13f6   :  { %v2309_v13 = vpop.f32.mrb[20].mxu0 }
0x13f7   :  { %v861_v37 = vpop.f32.mrb[21].mxu0 }
0x13f8   :  { %v2311_v14 = vpop.f32.mrb[22].mxu0  ;;  %v862_v46 = vadd.f32 %v2322_v11, %v861_v37 }
0x13f9   :  { %v2315_v41 = vpop.f32.mrb[23].mxu0 }
0x13fa   :  { %v943_v3 = vpop.f32.mrb[20].mxu1  ;;  %v865_v7 = vadd.f32 %v2322_v11, %v2315_v41 }
0x13fb   :  { %v1789_v42 = vpop.f32.mrb[21].mxu1  ;;  %v959_v43 = vadd.f32 %v2313_v38, %v943_v3  ;;  %v949_v47 = vadd.f32 %v943_v3, %v862_v46 }
0x13fc   :  { %v946_v44 = vpop.f32.mrb[22].mxu1 }
0x13fd   :  { %961 = vrot.lane.b32.xlu0 %v959_v43, %s1983_s28  ;;  %v1790_v45 = vpop.f32.mrb[23].mxu1  ;;  %v1615_v48 = vmul.f32 -1.442695, %v949_v47 }
0x13ff   :  { %1904 = vpow2.f32 %v1615_v48 }
0x1409   :  { %v1905_v49 = vpop.eup %1904 }
0x140a   :  { %v953_v50 = vadd.f32 1.0, %v1905_v49 }
0x140c   :  { %1906 = vrcp.f32 %v953_v50 }
0x1416   :  { %v1907_v51 = vpop.eup %1906 }
0x1417   :  { %v971_v63 = vsub.f32 1.0, %v1907_v51  ;;  %v977_v2 = vmul.f32 0.0, %v1907_v51 }
0x146f   :  { %v962_v52 = vpop.permute.xlu0 %961 }
0x1470   :  { %v964_v15 = vmul.f32 %v1907_v51, %v962_v52 }
0x1472   :  { %966 = vrot.lane.b32.xlu1 %v964_v15, %s1983_s28 }
0x14e4   :  { %v967_v53 = vpop.permute.xlu1 %966 }
0x14e5   :  { %v969_v55 = vadd.f32 %v967_v53, %v862_v46 }
0x14e7   :  { %1908 = vtanh.f32 %v969_v55 }
0x14e8   :  { %1910 = vpow2.f32 %v1604_v60  ;;  %v870_v60 = vadd.f32 %v2309_v13, %v2322_v11 }
0x14f1   :  { %v1909_v56 = vpop.eup %1908 }
0x14f2   :  { %973 = vrot.lane.b32.xlu0 %v1909_v56, %s1988_s27  ;;  %v1911_v16 = vpop.eup %1910 }
0x14f3   :  { %v748_v61 = vadd.f32 1.0, %v1911_v16 }
0x14f5   :  { %1912 = vrcp.f32 %v748_v61 }
0x14f6   :  { %753 = vrot.lane.b32.xlu0 %v751_v57, %s1983_s28 }
0x14ff   :  { %v1913_v6 = vpop.eup %1912 }
0x1500   :  { %v763_v36 = vsub.f32 1.0, %v1913_v6  ;;  %v769_v3 = vmul.f32 %v1913_v6, %v2276_v40 }
0x1564   :  { %v974_v0 = vpop.permute.xlu0 %973 }
0x1565   :  { %v976_v4 = vmul.f32 %v974_v0, %v971_v63 }
0x1567   :  { %v2331_v5 = vadd.f32 %v977_v2, %v976_v4 }
0x1568   :  { %v754_v8 = vpop.permute.xlu0 %753 }
0x1569   :  { %v756_v17 = vmul.f32 %v1913_v6, %v754_v8  ;;  %v979_v18 = vpack.c.bf16 %v2331_v5, %v2331_v5 }
0x156b   :  { %981 = vrot.lane.b32.xlu1 %v979_v18, %s1988_s27  ;;  %758 = vrot.lane.b32.xlu0 %v756_v17, %s1983_s28 }
0x15dd   :  { %v982_v24 = vpop.permute.xlu1 %981  ;;  %v759_v12 = vpop.permute.xlu0 %758 }
0x15de   :  { %v761_v19 = vadd.f32 %v759_v12, %v159_v58  ;;  %1796 = vmatmul.mubr.msk.bf16.vlgmr.msra.gmra.mrb[24].mxu1 %vm179_vm3, %v982_v24 }
0x15df   :  { %1808 = vmatpush3.bf16.msra.mxu1 %v2286_v31  ;;  %1811 = vmatprep.mubr.msk.bf16.mxu1 %vm1986_vm0, %v1985_v1 }
0x15e0   :  { %1914 = vtanh.f32 %v761_v19  ;;  %1809 = vmatprep.subr.bf16.mxu1 %v1985_v1 }
0x15e3   :  { %1810 = vmatpush3.bf16.msra.mxu1 %v2290_v32 }
0x15e4   :  { %1823 = vmatprep.subr.bf16.mxu1 %v1985_v1 }
0x15ea   :  { %v1915_v20 = vpop.eup %1914 }
0x15eb   :  { %765 = vrot.lane.b32.xlu0 %v1915_v20, %s1988_s27 }
0x15ef   :  { %799 = vrot.lane.b32.xlu0 %v783_v21, %s1988_s27 }
0x165d   :  { %v766_v9 = vpop.permute.xlu0 %765 }
0x165e   :  { %v768_v37 = vmul.f32 %v766_v9, %v763_v36 }
0x1660   :  { %v770_v42 = vadd.f32 %v769_v3, %v768_v37 }
0x1661   :  { %v800_v22 = vpop.permute.xlu0 %799 }
0x1662   :  { %1779 = vmatprep.mubr.msk.bf16.mxu0 %vm179_vm3, %v800_v22  ;;  %v784_v43 = vpack.c.bf16 %v770_v42, %v2276_v40 }
0x16b1   :  { %v1020_v23 = vpop.f32.mrb[24].mxu1 }
0x16b2   :  { %v1797_v25 = vpop.f32.mrb[25].mxu1  ;;  %v1033_v26 = vadd.f32 %v1020_v23, %v2313_v38  ;;  %v1026_v29 = vadd.f32 %v1020_v23, %v865_v7 }
0x16b3   :  { %v1023_v27 = vpop.f32.mrb[26].mxu1 }
0x16b4   :  { %1035 = vrot.lane.b32.xlu1 %v1033_v26, %s1983_s28  ;;  %v1798_v28 = vpop.f32.mrb[27].mxu1  ;;  %v1617_v30 = vmul.f32 -1.442695, %v1026_v29 }
0x16b5   :  { %v873_v28 = vadd.f32 %v2311_v14, %v2322_v11 }
0x16b6   :  { %1916 = vpow2.f32 %v1617_v30 }
0x16c0   :  { %v1917_v33 = vpop.eup %1916 }
0x16c1   :  { %v1030_v54 = vadd.f32 1.0, %v1917_v33 }
0x16c3   :  { %1918 = vrcp.f32 %v1030_v54 }
0x16cd   :  { %v1919_v10 = vpop.eup %1918 }
0x16ce   :  { %v1045_v44 = vsub.f32 1.0, %v1919_v10  ;;  %v1051_v46 = vmul.f32 %v1919_v10, %v2331_v5 }
0x1726   :  { %v1036_v34 = vpop.permute.xlu1 %1035 }
0x1727   :  { %v1038_v39 = vmul.f32 %v1919_v10, %v1036_v34 }
0x1729   :  { %1040 = vrot.lane.b32.xlu1 %v1038_v39, %s1983_s28 }
0x179b   :  { %v1041_v62 = vpop.permute.xlu1 %1040 }
0x179c   :  { %v1043_v35 = vadd.f32 %v1041_v62, %v865_v7 }
0x179e   :  { %1920 = vtanh.f32 %v1043_v35 }
0x17a8   :  { %v1921_v41 = vpop.eup %1920 }
0x17a9   :  { %1047 = vrot.lane.b32.xlu1 %v1921_v41, %s1988_s27 }
0x17ad   :  { %801 = vrot.lane.b32.xlu1 %v784_v43, %s1988_s27 }
0x181b   :  { %v1048_v45 = vpop.permute.xlu1 %1047 }
0x181c   :  { %v1050_v47 = vmul.f32 %v1048_v45, %v1045_v44 }
0x181e   :  { %v2359_v48 = vadd.f32 %v1051_v46, %v1050_v47 }
0x181f   :  { %v802_v49 = vpop.permute.xlu1 %801 }
0x1820   :  { %1780 = vmatmul.mubr.msk.bf16.gmra.mrb[24].mxu0 %vm179_vm3, %v802_v49  ;;  %v1053_v50 = vpack.c.bf16 %v2359_v48, %v2359_v48 }
0x1821   :  { %1803 = vmatprep.mubr.msk.bf16.mxu0 %vm1986_vm0, %v1985_v1 }
0x1822   :  { %1055 = vrot.lane.b32.xlu0 %v1053_v50, %s1988_s27 }
0x1894   :  { %v1056_v40 = vpop.permute.xlu0 %1055 }
0x1895   :  { %1804 = vmatmul.mubr.msk.bf16.vlgmr.msra.gmra.mrb[28].mxu0 %vm179_vm3, %v1056_v40 }
0x1896   :  { %1816 = vmatpush3.bf16.msra.mxu0 %v2286_v31  ;;  %1819 = vmatprep.mubr.msk.bf16.mxu0 %vm1986_vm0, %v1985_v1 }
0x1897   :  { %1817 = vmatprep.subr.bf16.mxu0 %v1985_v1 }
0x189a   :  { %1818 = vmatpush3.bf16.msra.mxu0 %v2290_v32 }
0x189b   :  { %1831 = vmatprep.subr.bf16.mxu0 %v1985_v1 }
0x18f3   :  { %v2374_v51 = vpop.f32.mrb[24].mxu0 }
0x18f4   :  { %v2376_v52 = vpop.f32.mrb[25].mxu0 }
0x18f5   :  { %v2378_v15 = vpop.f32.mrb[26].mxu0  ;;  %v878_v50 = vadd.f32 %v2322_v11, %v2376_v52 }
0x18f6   :  { %v2380_v53 = vpop.f32.mrb[27].mxu0 }
0x1968   :  { %v1094_v55 = vpop.f32.mrb[28].mxu0 }
0x1969   :  { %v1805_v56 = vpop.f32.mrb[29].mxu0  ;;  %v1107_v57 = vadd.f32 %v1094_v55, %v2313_v38  ;;  %v1100_v16 = vadd.f32 %v1094_v55, %v870_v60 }
0x196a   :  { %v1097_v58 = vpop.f32.mrb[30].mxu0 }
0x196b   :  { %1109 = vrot.lane.b32.xlu1 %v1107_v57, %s1983_s28  ;;  %v1806_v59 = vpop.f32.mrb[31].mxu0  ;;  %v1619_v61 = vmul.f32 -1.442695, %v1100_v16 }
0x196d   :  { %1922 = vpow2.f32 %v1619_v61 }
0x1977   :  { %v1923_v63 = vpop.eup %1922 }
0x1978   :  { %v1104_v0 = vadd.f32 1.0, %v1923_v63 }
0x197a   :  { %1924 = vrcp.f32 %v1104_v0 }
0x1984   :  { %v1925_v2 = vpop.eup %1924 }
0x1985   :  { %v1119_v24 = vsub.f32 1.0, %v1925_v2  ;;  %v1125_v13 = vmul.f32 %v1925_v2, %v2359_v48 }
0x19dd   :  { %v1110_v4 = vpop.permute.xlu1 %1109 }
0x19de   :  { %v1112_v6 = vmul.f32 %v1925_v2, %v1110_v4 }
0x19e0   :  { %1114 = vrot.lane.b32.xlu0 %v1112_v6, %s1983_s28 }
0x1a52   :  { %v1115_v8 = vpop.permute.xlu0 %1114 }
0x1a53   :  { %v1117_v17 = vadd.f32 %v1115_v8, %v870_v60 }
0x1a55   :  { %1926 = vtanh.f32 %v1117_v17 }
0x1a5f   :  { %v1927_v18 = vpop.eup %1926 }
0x1a60   :  { %1121 = vrot.lane.b32.xlu1 %v1927_v18, %s1988_s27 }
0x1ad2   :  { %v1122_v12 = vpop.permute.xlu1 %1121 }
0x1ad3   :  { %v1124_v19 = vmul.f32 %v1122_v12, %v1119_v24 }
0x1ad5   :  { %v2389_v20 = vadd.f32 %v1125_v13, %v1124_v19 }
0x1ad7   :  { %v1127_v21 = vpack.c.bf16 %v2389_v20, %v2389_v20 }
0x1ad9   :  { %1129 = vrot.lane.b32.xlu0 %v1127_v21, %s1988_s27  ;;  %v881_v21 = vadd.f32 %v2322_v11, %v2380_v53 }
0x1b4b   :  { %v1130_v9 = vpop.permute.xlu0 %1129 }
0x1b4c   :  { %1812 = vmatmul.mubr.msk.bf16.vlgmr.msra.gmra.mrb[28].mxu1 %vm179_vm3, %v1130_v9 }
0x1b4d   :  { %1824 = vmatpush3.bf16.msra.mxu1 %v2286_v31  ;;  %1827 = vmatprep.mubr.msk.bf16.mxu1 %vm1986_vm0, %v1985_v1 }
0x1b4e   :  { %1825 = vmatprep.subr.bf16.mxu1 %v1985_v1 }
0x1b51   :  { %1826 = vmatpush3.bf16.msra.mxu1 %v2290_v32 }
0x1b52   :  { %1839 = vmatprep.subr.bf16.mxu1 %v1985_v1 }
0x1c1f   :  { %v1168_v22 = vpop.f32.mrb[28].mxu1 }
0x1c20   :  { %v1813_v23 = vpop.f32.mrb[29].mxu1  ;;  %v1181_v25 = vadd.f32 %v1168_v22, %v2313_v38  ;;  %v1174_v7 = vadd.f32 %v1168_v22, %v873_v28 }
0x1c21   :  { %v1171_v26 = vpop.f32.mrb[30].mxu1 }
0x1c22   :  { %1183 = vrot.lane.b32.xlu1 %v1181_v25, %s1983_s28  ;;  %v1814_v27 = vpop.f32.mrb[31].mxu1  ;;  %v1621_v29 = vmul.f32 -1.442695, %v1174_v7 }
0x1c24   :  { %1928 = vpow2.f32 %v1621_v29 }
0x1c2e   :  { %v1929_v30 = vpop.eup %1928 }
0x1c2f   :  { %v1178_v33 = vadd.f32 1.0, %v1929_v30 }
0x1c31   :  { %1930 = vrcp.f32 %v1178_v33 }
0x1c3b   :  { %v1931_v54 = vpop.eup %1930 }
0x1c3c   :  { %v1193_v36 = vsub.f32 1.0, %v1931_v54  ;;  %v1199_v14 = vmul.f32 %v1931_v54, %v2389_v20 }
0x1c94   :  { %v1184_v10 = vpop.permute.xlu1 %1183 }
0x1c95   :  { %v1186_v34 = vmul.f32 %v1931_v54, %v1184_v10 }
0x1c97   :  { %1188 = vrot.lane.b32.xlu0 %v1186_v34, %s1983_s28 }
0x1d09   :  { %v1189_v39 = vpop.permute.xlu0 %1188 }
0x1d0a   :  { %v1191_v62 = vadd.f32 %v1189_v39, %v873_v28 }
0x1d0c   :  { %1932 = vtanh.f32 %v1191_v62 }
0x1d16   :  { %v1933_v35 = vpop.eup %1932 }
0x1d17   :  { %1195 = vrot.lane.b32.xlu1 %v1933_v35, %s1988_s27 }
0x1d89   :  { %v1196_v37 = vpop.permute.xlu1 %1195 }
0x1d8a   :  { %v1198_v3 = vmul.f32 %v1196_v37, %v1193_v36  ;;  %v886_v37 = vadd.f32 %v2374_v51, %v2322_v11 }
0x1d8c   :  { %v2408_v42 = vadd.f32 %v1199_v14, %v1198_v3 }
0x1d8e   :  { %v1201_v41 = vpack.c.bf16 %v2408_v42, %v2408_v42 }
0x1d90   :  { %1203 = vrot.lane.b32.xlu0 %v1201_v41, %s1988_s27 }
0x1e02   :  { %v1204_v43 = vpop.permute.xlu0 %1203 }
0x1e03   :  { %1820 = vmatmul.mubr.msk.bf16.vlgmr.msra.gmra.mrb[32].mxu0 %vm179_vm3, %v1204_v43 }
0x1e04   :  { %1832 = vmatpush3.bf16.msra.mxu0 %v2286_v31  ;;  %1835 = vmatprep.mubr.msk.bf16.mxu0 %vm1986_vm0, %v1985_v1 }
0x1e05   :  { %1833 = vmatprep.subr.bf16.mxu0 %v1985_v1 }
0x1e08   :  { %1834 = vmatpush3.bf16.msra.mxu0 %v2290_v32 }
0x1ed6   :  { %v1242_v44 = vpop.f32.mrb[32].mxu0 }
0x1ed7   :  { %v1821_v45 = vpop.f32.mrb[33].mxu0  ;;  %v1255_v46 = vadd.f32 %v1242_v44, %v2313_v38  ;;  %v1248_v40 = vadd.f32 %v1242_v44, %v878_v50 }
0x1ed8   :  { %v1245_v47 = vpop.f32.mrb[34].mxu0 }
0x1ed9   :  { %1257 = vrot.lane.b32.xlu1 %v1255_v46, %s1983_s28  ;;  %v1822_v49 = vpop.f32.mrb[35].mxu0  ;;  %v1623_v55 = vmul.f32 -1.442695, %v1248_v40 }
0x1edb   :  { %1934 = vpow2.f32 %v1623_v55 }
0x1ee5   :  { %v1935_v56 = vpop.eup %1934 }
0x1ee6   :  { %v1252_v57 = vadd.f32 1.0, %v1935_v56 }
0x1ee8   :  { %1936 = vrcp.f32 %v1252_v57 }
0x1ef2   :  { %v1937_v58 = vpop.eup %1936 }
0x1ef3   :  { %v1267_v0 = vsub.f32 1.0, %v1937_v58  ;;  %v1273_v52 = vmul.f32 %v1937_v58, %v2408_v42 }
0x1f4b   :  { %v1258_v59 = vpop.permute.xlu1 %1257 }
0x1f4c   :  { %v1260_v60 = vmul.f32 %v1937_v58, %v1258_v59 }
0x1f4e   :  { %1262 = vrot.lane.b32.xlu0 %v1260_v60, %s1983_s28 }
0x1fc0   :  { %v1263_v16 = vpop.permute.xlu0 %1262 }
0x1fc1   :  { %v1265_v61 = vadd.f32 %v1263_v16, %v878_v50 }
0x1fc3   :  { %1938 = vtanh.f32 %v1265_v61 }
0x1fcd   :  { %v1939_v63 = vpop.eup %1938 }
0x1fce   :  { %1269 = vrot.lane.b32.xlu1 %v1939_v63, %s1988_s27 }
0x2040   :  { %v1270_v2 = vpop.permute.xlu1 %1269 }
0x2041   :  { %v1272_v4 = vmul.f32 %v1270_v2, %v1267_v0  ;;  %v1497_v2 = vld [vmem:[%s2523_s9] sm:$0xff] }
0x2043   :  { %v2426_v6 = vadd.f32 %v1273_v52, %v1272_v4  ;;  %v1631_v52 = vld [vmem:[%s2523_s9 + $0x10] sm:$0xff]  ;;  %v1634_v4 = vld [vmem:[%s2523_s9 + $0x28] sm:$0xff] }
0x2045   :  { %v1275_v8 = vpack.c.bf16 %v2426_v6, %v2426_v6 }
0x2047   :  { %1277 = vrot.lane.b32.xlu0 %v1275_v8, %s1988_s27  ;;  %v889_v8 = vadd.f32 %v2378_v15, %v2322_v11  ;;  %v1632_v11 = vld [vmem:[%s2523_s9 + $0x18] sm:$0xff] }
0x20b9   :  { %v1278_v17 = vpop.permute.xlu0 %1277 }
0x20ba   :  { %1828 = vmatmul.mubr.msk.bf16.vlgmr.msra.gmra.mrb[32].mxu1 %vm179_vm3, %v1278_v17 }
0x20bb   :  { %1840 = vmatpush3.bf16.msra.mxu1 %v2286_v31  ;;  %1843 = vmatprep.mubr.msk.bf16.mxu1 %vm1986_vm0, %v1985_v1 }
0x20bc   :  { %1841 = vmatprep.subr.bf16.mxu1 %v1985_v1 }
0x20bf   :  { %1842 = vmatpush3.bf16.msra.mxu1 %v2290_v32 }
0x218d   :  { %v1316_v18 = vpop.f32.mrb[32].mxu1 }
0x218e   :  { %v1829_v24 = vpop.f32.mrb[33].mxu1  ;;  %v1329_v12 = vadd.f32 %v1316_v18, %v2313_v38  ;;  %v1322_v9 = vadd.f32 %v1316_v18, %v881_v21 }
0x218f   :  { %v1319_v13 = vpop.f32.mrb[34].mxu1 }
0x2190   :  { %1331 = vrot.lane.b32.xlu1 %v1329_v12, %s1983_s28  ;;  %v1830_v19 = vpop.f32.mrb[35].mxu1  ;;  %v1625_v31 = vmul.f32 -1.442695, %v1322_v9  ;;  %v1636_v9 = vld [vmem:[%s2523_s9 + $0x38] sm:$0xff] }
0x2192   :  { %1940 = vpow2.f32 %v1625_v31  ;;  %v1630_v31 = vld [vmem:[%s2523_s9 + $0x8] sm:$0xff] }
0x219c   :  { %v1941_v22 = vpop.eup %1940 }
0x219d   :  { %v1326_v23 = vadd.f32 1.0, %v1941_v22 }
0x219f   :  { %1942 = vrcp.f32 %v1326_v23 }
0x21a9   :  { %v1943_v1 = vpop.eup %1942 }
0x21aa   :  { %v1341_v7 = vsub.f32 1.0, %v1943_v1  ;;  %v1347_v53 = vmul.f32 %v1943_v1, %v2426_v6 }
0x2202   :  { %v1332_v25 = vpop.permute.xlu1 %1331 }
0x2203   :  { %v1334_v32 = vmul.f32 %v1943_v1, %v1332_v25  ;;  %v1635_v1 = vld [vmem:[%s2523_s9 + $0x30] sm:$0xff] }
0x2205   :  { %1336 = vrot.lane.b32.xlu0 %v1334_v32, %s1983_s28 }
0x2277   :  { %v1337_v26 = vpop.permute.xlu0 %1336 }
0x2278   :  { %v1339_v27 = vadd.f32 %v1337_v26, %v881_v21 }
0x227a   :  { %1944 = vtanh.f32 %v1339_v27 }
0x2284   :  { %v1945_v28 = vpop.eup %1944 }
0x2285   :  { %1343 = vrot.lane.b32.xlu1 %v1945_v28, %s1988_s27 }
0x22f7   :  { %v1344_v29 = vpop.permute.xlu1 %1343 }
0x22f8   :  { %v1346_v30 = vmul.f32 %v1344_v29, %v1341_v7 }
0x22fa   :  { %v2444_v33 = vadd.f32 %v1347_v53, %v1346_v30 }
0x22fc   :  { %v1349_v54 = vpack.c.bf16 %v2444_v33, %v2444_v33 }
0x22fe   :  { %1351 = vrot.lane.b32.xlu0 %v1349_v54, %s1988_s27 }
0x2370   :  { %v1352_v10 = vpop.permute.xlu0 %1351 }
0x2371   :  { %1836 = vmatmul.mubr.msk.bf16.vlgmr.msra.gmra.mrb[36].mxu0 %vm179_vm3, %v1352_v10 }
0x2444   :  { %v1390_v34 = vpop.f32.mrb[36].mxu0 }
0x2445   :  { %v1837_v39 = vpop.f32.mrb[37].mxu0  ;;  %v1403_v62 = vadd.f32 %v1390_v34, %v2313_v38  ;;  %v1396_v14 = vadd.f32 %v1390_v34, %v886_v37 }
0x2446   :  { %v1393_v35 = vpop.f32.mrb[38].mxu0 }
0x2447   :  { %1405 = vrot.lane.b32.xlu1 %v1403_v62, %s1983_s28  ;;  %v1838_v36 = vpop.f32.mrb[39].mxu0  ;;  %v1627_v3 = vmul.f32 -1.442695, %v1396_v14 }
0x2449   :  { %1946 = vpow2.f32 %v1627_v3 }
0x2453   :  { %v1947_v41 = vpop.eup %1946 }
0x2454   :  { %v1400_v43 = vadd.f32 1.0, %v1947_v41 }
0x2456   :  { %1948 = vrcp.f32 %v1400_v43 }
0x2460   :  { %v1949_v44 = vpop.eup %1948 }
0x2461   :  { %v1415_v40 = vsub.f32 1.0, %v1949_v44  ;;  %v1421_v51 = vmul.f32 %v1949_v44, %v2444_v33 }
0x24b9   :  { %v1406_v45 = vpop.permute.xlu1 %1405 }
0x24ba   :  { %v1408_v46 = vmul.f32 %v1949_v44, %v1406_v45 }
0x24bc   :  { %1410 = vrot.lane.b32.xlu0 %v1408_v46, %s1983_s28 }
0x252e   :  { %v1411_v47 = vpop.permute.xlu0 %1410 }
0x252f   :  { %v1413_v49 = vadd.f32 %v1411_v47, %v886_v37 }
0x2531   :  { %1950 = vtanh.f32 %v1413_v49  ;;  %v1637_v49 = vld [vmem:[#allocation2] ss:$0 sm:$0xff] }
0x253b   :  { %v1951_v50 = vpop.eup %1950 }
0x253c   :  { %1417 = vrot.lane.b32.xlu1 %v1951_v50, %s1988_s27 }
0x25ae   :  { %v1418_v55 = vpop.permute.xlu1 %1417 }
0x25af   :  { %v1420_v56 = vmul.f32 %v1418_v55, %v1415_v40 }
0x25b1   :  { %v2457_v57 = vadd.f32 %v1421_v51, %v1420_v56 }
0x25b3   :  { %v1423_v58 = vpack.c.bf16 %v2457_v57, %v2457_v57 }
0x25b5   :  { %1425 = vrot.lane.b32.xlu0 %v1423_v58, %s1988_s27 }
0x2627   :  { %v1426_v59 = vpop.permute.xlu0 %1425 }
0x2628   :  { %1844 = vmatmul.mubr.msk.bf16.vlgmr.msra.gmra.mrb[36].mxu1 %vm179_vm3, %v1426_v59 }
0x26fb   :  { %v1464_v60 = vpop.f32.mrb[36].mxu1 }
0x26fc   :  { %v1845_v16 = vpop.f32.mrb[37].mxu1  ;;  %v1477_v61 = vadd.f32 %v1464_v60, %v2313_v38  ;;  %v1633_v38 = vld [vmem:[%s2523_s9 + $0x20] sm:$0xff]  ;;  %v1470_v17 = vadd.f32 %v1464_v60, %v889_v8 }
0x26fd   :  { %v1467_v63 = vpop.f32.mrb[38].mxu1 }
0x26fe   :  { %1479 = vrot.lane.b32.xlu1 %v1477_v61, %s1983_s28  ;;  %v1846_v0 = vpop.f32.mrb[39].mxu1  ;;  %v1629_v18 = vmul.f32 -1.442695, %v1470_v17 }
0x2700   :  { %1952 = vpow2.f32 %v1629_v18 }
0x2702   :  { %1499 = vrot.lane.b32.xlu1 %v1497_v2, %s1989_s1 }
0x2706   :  { %1515 = vrot.lane.b32.xlu1 %v1631_v52, %s1989_s1 }
0x270a   :  { %1531 = vrot.lane.b32.xlu1 %v1633_v38, %s1989_s1  ;;  %v1953_v24 = vpop.eup %1952 }
0x270b   :  { %v1474_v12 = vadd.f32 1.0, %v1953_v24 }
0x270d   :  { %1954 = vrcp.f32 %v1474_v12 }
0x270e   :  { %1539 = vrot.lane.b32.xlu1 %v1634_v4, %s1989_s1 }
0x2712   :  { %1555 = vrot.lane.b32.xlu1 %v1636_v9, %s1989_s1 }
0x2717   :  { %v1955_v13 = vpop.eup %1954 }
0x2718   :  { %v1489_v62 = vsub.f32 1.0, %v1955_v13 }
0x2770   :  { %v1480_v19 = vpop.permute.xlu1 %1479 }
0x2771   :  { %v1482_v21 = vmul.f32 %v1955_v13, %v1480_v19 }
0x2773   :  { %1484 = vrot.lane.b32.xlu0 %v1482_v21, %s1983_s28 }
0x2774   :  { %v1500_v25 = vpop.permute.xlu1 %1499 }
0x2775   :  { %v1502_v27 = vmul.f32 %v1500_v25, %v2331_v5 }
0x2777   :  { %1507 = vrot.lane.b32.xlu0 %v1630_v31, %s1989_s1 }
0x2778   :  { %v1516_v28 = vpop.permute.xlu1 %1515 }
0x2779   :  { %v1518_v53 = vmul.f32 %v1516_v28, %v2389_v20 }
0x277b   :  { %1523 = vrot.lane.b32.xlu0 %v1632_v11, %s1989_s1 }
0x277c   :  { %v1532_v10 = vpop.permute.xlu1 %1531 }
0x277d   :  { %v1534_v39 = vmul.f32 %v1532_v10, %v2426_v6 }
0x2780   :  { %v1540_v35 = vpop.permute.xlu1 %1539 }
0x2781   :  { %v1542_v5 = vmul.f32 %v1540_v35, %v2444_v33 }
0x2784   :  { %v1556_v41 = vpop.permute.xlu1 %1555 }
0x27e5   :  { %v1485_v15 = vpop.permute.xlu0 %1484 }
0x27e6   :  { %v1487_v22 = vadd.f32 %v1485_v15, %v889_v8 }
0x27e8   :  { %1956 = vtanh.f32 %v1487_v22 }
0x27e9   :  { %v1508_v32 = vpop.permute.xlu0 %1507 }
0x27ea   :  { %v1510_v26 = vmul.f32 %v1508_v32, %v2359_v48  ;;  %v1495_v48 = vmul.f32 %v1955_v13, %v2457_v57 }
0x27ec   :  { %v1511_v7 = vadd.f32 %v1510_v26, %v1502_v27 }
0x27ed   :  { %v1524_v29 = vpop.permute.xlu0 %1523 }
0x27ee   :  { %v1519_v30 = vadd.f32 %v1518_v53, %v1511_v7  ;;  %v1526_v54 = vmul.f32 %v1524_v29, %v2408_v42 }
0x27f0   :  { %v1527_v34 = vadd.f32 %v1526_v54, %v1519_v30 }
0x27f2   :  { %v1957_v23 = vpop.eup %1956  ;;  %v1535_v37 = vadd.f32 %v1534_v39, %v1527_v34 }
0x27f3   :  { %1491 = vrot.lane.b32.xlu0 %v1957_v23, %s1988_s27 }
0x27f4   :  { %v1543_v20 = vadd.f32 %v1542_v5, %v1535_v37 }
0x27f7   :  { %1547 = vrot.lane.b32.xlu0 %v1635_v1, %s1989_s1 }
0x2865   :  { %v1492_v36 = vpop.permute.xlu0 %1491 }
0x2866   :  { %v1494_v14 = vmul.f32 %v1492_v36, %v1489_v62 }
0x2868   :  { %v1496_v3 = vadd.f32 %v1495_v48, %v1494_v14 }
0x2869   :  { %v1548_v43 = vpop.permute.xlu0 %1547 }
0x286a   :  { %v1550_v44 = vmul.f32 %v1548_v43, %v2457_v57  ;;  %v1558_v42 = vmul.f32 %v1556_v41, %v1496_v3 }
0x286c   :  { %v1551_v45 = vadd.f32 %v1550_v44, %v1543_v20 }
0x286e   :  { %v1559_v46 = vadd.f32 %v1558_v42, %v1551_v45 }
0x2870   :  { %1561 = vrot.lane.b32.xlu0 %v1559_v46, %s1988_s27 }
0x28e2   :  { %v1562_v6 = vpop.permute.xlu0 %1561 }
0x28e3   :  { %v1564_v47 = vsel %vm179_vm3, %v1562_v6, 0.0 }
0x28e4   :  { %1565 = vadd.xlane.f32.xlu1 %v1564_v47 }
0x2971   :  { %v1566_v50 = vpop.xlane.xlu1 %1565 }
0x2972   :  { %v1574_v40 = vadd.f32 %v1637_v49, %v1566_v50 }
0x2974   :  { %1576 = vst.msk [vmem:[%s2525_s11] sm:$0xff] %vm1575_vm4, %v1574_v40 }
0x2975   :  { %1581 = vsyncpa [#allocation4], 1 }

</bundles_post_ra>
